<compile_context>
chip_gen: v7x
topology: tpu7x:2x2x1
jax: 0.10.0
libtpu: 0.0.40
codegen_flags: <defaults>
</compile_context>

<pallas_src>
import functools
import math

import jax
import jax.numpy as jnp
from jax.experimental import pallas as pl
from jax.experimental.pallas import tpu as pltpu


_GELU_C = 0.7978845608028654  # sqrt(2/pi)
_VMEM = pl.BlockSpec(memory_space=pltpu.MemorySpace.VMEM)


def _layer_norm(x, g, b, eps):
    mean = jnp.mean(x, axis=-1, keepdims=True)
    var = jnp.mean(jnp.square(x - mean), axis=-1, keepdims=True)
    return (x - mean) * jax.lax.rsqrt(var + eps) * g + b


def _gelu_fast(x):
    # HF Vivit default hidden_act = "gelu_fast"
    return 0.5 * x * (1.0 + jnp.tanh(_GELU_C * x * (1.0 + 0.044715 * x * x)))


def _rep(arr):
    """Full-array block, replicated across the grid (constant index map)."""
    nd = arr.ndim
    return pl.BlockSpec(arr.shape, lambda *_: (0,) * nd)


def _cparams(n_axes):
    return pltpu.CompilerParams(
        dimension_semantics=("parallel",) * n_axes,
        vmem_limit_bytes=48 * 1024 * 1024)


# ---------------------------- Pallas kernels ----------------------------

def _embed_kernel(tok_ref, w_ref, add_ref, o_ref):
    """Tubelet embedding: tokens @ W + (pos/cls/bias folded into add). One store."""
    emb = jnp.dot(tok_ref[0], w_ref[...],
                  preferred_element_type=jnp.float32) + add_ref[...]
    o_ref[0] = emb.astype(o_ref.dtype)


def _ln_qkv_kernel(h_ref, g_ref, b_ref, wqkv_ref, bqkv_ref, o_ref, *, eps):
    """LN1 + fused QKV projection for one token tile."""
    x = h_ref[0].astype(jnp.float32)                                  # (tq, H)
    ln1 = _layer_norm(x, g_ref[...], b_ref[...], eps)
    qkv = jnp.dot(ln1.astype(jnp.bfloat16), wqkv_ref[...],
                  preferred_element_type=jnp.float32) + bqkv_ref[...]  # (tq, 3H)
    o_ref[0] = qkv.astype(o_ref.dtype)


def _attn_kernel(q_ref, k_ref, v_ref, o_ref, *, seq_len, scale):
    """Softmax attention, all heads batched in a single dot_general."""
    q = q_ref[0]                                                       # (nh, tq, dh) bf16
    k = k_ref[0]                                                       # (nh, SP, dh) bf16
    v = v_ref[0]                                                       # (nh, SP, dh) bf16
    s = jax.lax.dot_general(q, k, (((2,), (2,)), ((0,), (0,))),
                            preferred_element_type=jnp.float32) * scale  # (nh, tq, SP)
    if s.shape[-1] > seq_len:        # static: mask padded key positions only
        kpos = jax.lax.broadcasted_iota(jnp.int32, s.shape, 2)
        s = jnp.where(kpos < seq_len, s, -1e30)
    m = jnp.max(s, axis=-1, keepdims=True)
    p = jnp.exp(s - m)
    p = p * pl.reciprocal(jnp.sum(p, axis=-1, keepdims=True), approx=True)
    ctx = jax.lax.dot_general(p.astype(jnp.bfloat16), v,
                              (((2,), (1,)), ((0,), (0,))),
                              preferred_element_type=jnp.float32)        # (nh, tq, dh)
    o_ref[0] = ctx.astype(o_ref.dtype)


def _proj_mlp_kernel(h_ref, ctx_ref, wo_ref, bo_ref, ln2g_ref, ln2b_ref,
                     w1_ref, b1_ref, w2_ref, b2_ref, o_ref, *, eps):
    """Attention out-proj + residual + LN2 + fc1/gelu/fc2 + residual."""
    x = h_ref[0].astype(jnp.float32)                                   # (tq, H)
    attn = jnp.dot(ctx_ref[0], wo_ref[...],
                   preferred_element_type=jnp.float32) + bo_ref[...]    # single (tq,H)@(H,H)
    x = x + attn
    ln2 = _layer_norm(x, ln2g_ref[...], ln2b_ref[...], eps)
    mid = jnp.dot(ln2.astype(jnp.bfloat16), w1_ref[...],
                  preferred_element_type=jnp.float32) + b1_ref[...]
    mid = _gelu_fast(mid)
    mlp = jnp.dot(mid.astype(jnp.bfloat16), w2_ref[...],
                  preferred_element_type=jnp.float32) + b2_ref[...]
    o_ref[0] = (x + mlp).astype(o_ref.dtype)


def _head_kernel(h_ref, g_ref, b_ref, w_ref, hb_ref, o_ref, *, eps):
    """Final layernorm + classifier on the B CLS rows only."""
    y = _layer_norm(h_ref[...].astype(jnp.float32), g_ref[...], b_ref[...], eps)
    logits = jnp.dot(y.astype(jnp.bfloat16), w_ref[...],
                     preferred_element_type=jnp.float32) + hb_ref[...]
    o_ref[...] = logits.astype(o_ref.dtype)


# ---------------------------- Pallas wrappers ----------------------------

def embed(tokens, patch_w, add_rows):
    B, SP, P = tokens.shape
    H = patch_w.shape[1]
    return pl.pallas_call(
        _embed_kernel,
        grid=(B,),
        in_specs=[pl.BlockSpec((1, SP, P), lambda b: (b, 0, 0)),
                  _rep(patch_w), _rep(add_rows)],
        out_specs=pl.BlockSpec((1, SP, H), lambda b: (b, 0, 0)),
        out_shape=jax.ShapeDtypeStruct((B, SP, H), jnp.bfloat16),
        compiler_params=_cparams(1),
    )(tokens, patch_w, add_rows)


def encoder_layer(h, lyr, *, num_heads, head_dim, seq_len, token_tile, eps):
    B, SP, H = h.shape
    nT = SP // token_tile
    tok = pl.BlockSpec((1, token_tile, H), lambda b, t: (b, t, 0))

    # --- LN1 + fused QKV projection (lane-dense (tq, 3H) store) ---
    qkv = pl.pallas_call(
        functools.partial(_ln_qkv_kernel, eps=eps),
        grid=(B, nT),
        in_specs=[tok] + [_rep(w) for w in
                          (lyr["ln1_g"], lyr["ln1_b"], lyr["wqkv"], lyr["bqkv"])],
        out_specs=pl.BlockSpec((1, token_tile, 3 * H), lambda b, t: (b, t, 0)),
        out_shape=jax.ShapeDtypeStruct((B, SP, 3 * H), jnp.bfloat16),
        compiler_params=_cparams(2),
    )(h, lyr["ln1_g"], lyr["ln1_b"], lyr["wqkv"], lyr["bqkv"])

    # to_heads in XLA (keeps head split off the kernel's lane axis entirely)
    qkv = qkv.reshape(B, SP, 3, num_heads, head_dim)
    q = jnp.transpose(qkv[:, :, 0], (0, 2, 1, 3))       # (B, nh, SP, dh)
    k = jnp.transpose(qkv[:, :, 1], (0, 2, 1, 3))
    v = jnp.transpose(qkv[:, :, 2], (0, 2, 1, 3))
    # TODO(synk): for full-size S, pre-transpose K to (B, nh, dh, S) and tile KV
    # with an online softmax (flash) instead of keeping full K/V per instance.

    # --- attention: one batched dot_general over heads per query tile ---
    ctx = pl.pallas_call(
        functools.partial(_attn_kernel, seq_len=seq_len,
                          scale=1.0 / math.sqrt(head_dim)),
        grid=(B, nT),
        in_specs=[pl.BlockSpec((1, num_heads, token_tile, head_dim),
                               lambda b, t: (b, 0, t, 0)),
                  pl.BlockSpec((1, num_heads, SP, head_dim),
                               lambda b, t: (b, 0, 0, 0)),
                  pl.BlockSpec((1, num_heads, SP, head_dim),
                               lambda b, t: (b, 0, 0, 0))],
        out_specs=pl.BlockSpec((1, num_heads, token_tile, head_dim),
                               lambda b, t: (b, 0, t, 0)),
        out_shape=jax.ShapeDtypeStruct((B, num_heads, SP, head_dim), jnp.bfloat16),
        compiler_params=_cparams(2),
    )(q, k, v)

    # from_heads in XLA -> contiguous (B, SP, H) for one (tq,H)@(H,H) out-proj
    ctx = jnp.transpose(ctx, (0, 2, 1, 3)).reshape(B, SP, H)

    # --- out-proj + residual + LN2 + MLP + residual ---
    weights = (lyr["wo"], lyr["bo"], lyr["ln2_g"], lyr["ln2_b"],
               lyr["w1"], lyr["b1"], lyr["w2"], lyr["b2"])
    return pl.pallas_call(
        functools.partial(_proj_mlp_kernel, eps=eps),
        grid=(B, nT),
        in_specs=[tok, tok] + [_rep(w) for w in weights],
        out_specs=tok,
        out_shape=jax.ShapeDtypeStruct((B, SP, H), jnp.bfloat16),
        compiler_params=_cparams(2),
    )(h, ctx, *weights)


def cls_head(cls_rows, lnf_g, lnf_b, head_w, head_b, *, eps):
    B, H = cls_rows.shape
    C = head_w.shape[1]
    return pl.pallas_call(
        functools.partial(_head_kernel, eps=eps),
        in_specs=[_VMEM] * 5,
        out_specs=_VMEM,
        out_shape=jax.ShapeDtypeStruct((B, C), jnp.float32),
    )(cls_rows, lnf_g, lnf_b, head_w, head_b)


# ---------------------------- Model (glue in JAX) ----------------------------

def patchify(x, tt, ph, pw):
    """x: (B, C, T, H, W) -> (B, N, C*tt*ph*pw); patch features ordered
    (c, t, h, w) and tokens ordered (t, h, w), matching Conv3d tubelet embed."""
    B, C, T, H, W = x.shape
    Tn, Hn, Wn = T // tt, H // ph, W // pw
    x = x.reshape(B, C, Tn, tt, Hn, ph, Wn, pw)
    x = x.transpose(0, 2, 4, 6, 1, 3, 5, 7)
    return x.reshape(B, Tn * Hn * Wn, C * tt * ph * pw)


def model_forward(x_3d, params, cfg):
    """x_3d: (B, C, T, H, W) -> logits (B, num_classes)."""
    H = cfg["hidden_size"]
    nh = cfg["num_heads"]
    dh = H // nh
    tt, ph, pw = cfg["tubelet"]
    tq = cfg["token_tile"]

    patches = patchify(x_3d, tt, ph, pw).astype(jnp.bfloat16)      # (B, N, P)
    B, N, P = patches.shape
    S = N + 1
    SP = ((S + tq - 1) // tq) * tq                                  # padded seq

    # Fold CLS token, position embedding and patch bias into one additive
    # (SP, H) matrix; pad the token matrix so the embed kernel is a single
    # matmul + add + unmasked store (review: no sublane-offset partial stores).
    add_rows = jnp.concatenate([
        params["cls_token"] + params["pos_emb"][0:1],
        params["pos_emb"][1:] + params["patch_b"],
        jnp.zeros((SP - S, H), jnp.float32),
    ], axis=0)
    tokens = jnp.concatenate([
        jnp.zeros((B, 1, P), patches.dtype),        # CLS slot (handled via add)
        patches,
        jnp.zeros((B, SP - S, P), patches.dtype),   # padding rows
    ], axis=1)

    h = embed(tokens, params["patch_w"], add_rows)                  # (B, SP, H) bf16

    for lyr in params["layers"]:
        h = encoder_layer(h, lyr, num_heads=nh, head_dim=dh, seq_len=S,
                          token_tile=tq, eps=cfg["ln_eps"])

    cls_rows = h[:, 0, :]                                           # (B, H) CLS only
    return cls_head(cls_rows, params["lnf_g"], params["lnf_b"],
                    params["head_w"], params["head_b"], eps=cfg["ln_eps"])


# ---------------------------- Deterministic init ----------------------------

def init_params(key, cfg):
    H = cfg["hidden_size"]
    I = cfg["intermediate_size"]
    C = cfg["channels"]
    tt, ph, pw = cfg["tubelet"]
    patch_dim = C * tt * ph * pw
    Tn = cfg["num_frames"] // tt
    Gn = cfg["image_size"] // ph
    N = Tn * Gn * Gn
    std = cfg["init_range"]

    keys = iter(jax.random.split(key, 128))

    def w(shape, dtype=jnp.bfloat16):
        return (std * jax.random.normal(next(keys), shape, jnp.float32)).astype(dtype)

    zeros = lambda s: jnp.zeros(s, jnp.float32)
    ones = lambda s: jnp.ones(s, jnp.float32)

    params = {
        "patch_w": w((patch_dim, H)), "patch_b": zeros((1, H)),
        "cls_token": w((1, H), jnp.float32),
        "pos_emb": w((N + 1, H), jnp.float32),
        "lnf_g": ones((1, H)), "lnf_b": zeros((1, H)),
        "head_w": w((H, cfg["num_classes"])), "head_b": zeros((1, cfg["num_classes"])),
        "layers": [],
    }
    for _ in range(cfg["num_layers"]):
        params["layers"].append({
            "ln1_g": ones((1, H)), "ln1_b": zeros((1, H)),
            "wqkv": w((H, 3 * H)), "bqkv": zeros((1, 3 * H)),    # fused Q/K/V
            "wo": w((H, H)), "bo": zeros((1, H)),
            "ln2_g": ones((1, H)), "ln2_b": zeros((1, H)),
            "w1": w((H, I)), "b1": zeros((1, I)),
            "w2": w((I, H)), "b2": zeros((1, H)),
        })
    return params


# ---------------------------- Main ----------------------------

if __name__ == "__main__":
    cfg = dict(
        num_classes=2,
        image_size=32,
        num_frames=4,
        tubelet=(2, 16, 16),       # (t, h, w) tubelet / patch size
        hidden_size=128,           # lane-dense demo hidden (full size: 768)
        num_heads=4,
        num_layers=2,
        intermediate_size=256,
        token_tile=8,              # query-token tile (full size: 256-512)
        ln_eps=1e-6,
        init_range=0.02,
        channels=3,
    )

    key = jax.random.PRNGKey(0)
    kp, kx = jax.random.split(key)
    params = init_params(kp, cfg)

    # Input matches the PyTorch module's x_3d layout: (B, C, T, H, W)
    x_3d = jax.random.normal(kx, (2, cfg["channels"], cfg["num_frames"],
                                  cfg["image_size"], cfg["image_size"]), jnp.float32)

    fwd = jax.jit(functools.partial(model_forward, cfg=cfg))
    logits = jax.block_until_ready(fwd(x_3d, params))
    assert logits.shape == (2, cfg["num_classes"]), logits.shape
    print("KERNEL_OK")
</pallas_src>

<mosaic_0001>
module attributes {stable_mosaic.version = 11 : i64} {
  func.func @_embed_kernel(%arg0: i32, %arg1: memref<1x16x1536xbf16, #tpu.memory_space<vmem>>, %arg2: memref<1536x128xbf16, #tpu.memory_space<vmem>>, %arg3: memref<16x128xf32, #tpu.memory_space<vmem>>, %arg4: memref<1x16x128xbf16, #tpu.memory_space<vmem>>) attributes {dimension_semantics = [#tpu.dimension_semantics<parallel>], iteration_bounds = array<i64: 2>, scalar_prefetch = 0 : i64, scratch_operands = 0 : i64, tpu.core_type = #tpu.core_type<tc>, window_params = [{transform_indices = @transform_0, window_bounds = array<i64: 1, 16, 1536>}, {pipeline_mode = #tpu.pipeline_mode<synchronous>, transform_indices = @transform_1, window_bounds = array<i64: 1536, 128>}, {pipeline_mode = #tpu.pipeline_mode<synchronous>, transform_indices = @transform_2, window_bounds = array<i64: 16, 128>}, {transform_indices = @transform_3, window_bounds = array<i64: 1, 16, 128>}]} {
    %c0 = arith.constant 0 : index
    %c0_0 = arith.constant 0 : index
    %c0_1 = arith.constant 0 : index
    %0 = vector.load %arg1[%c0, %c0_0, %c0_1] : memref<1x16x1536xbf16, #tpu.memory_space<vmem>>, vector<1x16x1536xbf16>
    %1 = vector.shape_cast %0 : vector<1x16x1536xbf16> to vector<16x1536xbf16>
    %c0_2 = arith.constant 0 : index
    %c0_3 = arith.constant 0 : index
    %2 = vector.load %arg2[%c0_2, %c0_3] : memref<1536x128xbf16, #tpu.memory_space<vmem>>, vector<1536x128xbf16>
    %cst = arith.constant dense<0.000000e+00> : vector<16x128xf32>
    %3 = tpu.matmul %1, %2, %cst {dimension_numbers = #tpu.dot_dimension_numbers<[1], [0], [0], [1], [0, 0, 1, 1], [], []>} : vector<16x1536xbf16>, vector<1536x128xbf16>, vector<16x128xf32> -> vector<16x128xf32>
    %c0_4 = arith.constant 0 : index
    %c0_5 = arith.constant 0 : index
    %4 = vector.load %arg3[%c0_4, %c0_5] : memref<16x128xf32, #tpu.memory_space<vmem>>, vector<16x128xf32>
    %5 = arith.addf %3, %4 : vector<16x128xf32>
    %6 = arith.truncf %5 : vector<16x128xf32> to vector<16x128xbf16>
    %c0_6 = arith.constant 0 : index
    %c0_7 = arith.constant 0 : index
    %c0_8 = arith.constant 0 : index
    %7 = vector.load %arg4[%c0_6, %c0_7, %c0_8] : memref<1x16x128xbf16, #tpu.memory_space<vmem>>, vector<1x16x128xbf16>
    %8 = vector.shape_cast %7 : vector<1x16x128xbf16> to vector<16x128xbf16>
    %9 = vector.shape_cast %6 : vector<16x128xbf16> to vector<1x16x128xbf16>
    tpu.vector_store %arg4[%c0_6, %c0_7, %c0_8], %9 {strides = array<i32>} : memref<1x16x128xbf16, #tpu.memory_space<vmem>>, vector<1x16x128xbf16>,
    return
  }
  func.func @transform_0(%arg0: i32) -> (i32, i32, i32) {
    %c0_i32 = arith.constant 0 : i32
    %c0_i32_0 = arith.constant 0 : i32
    %c0_i32_1 = arith.constant 0 : i32
    return %arg0, %c0_i32, %c0_i32_0 : i32, i32, i32
  }
  func.func @transform_1(%arg0: i32) -> (i32, i32) {
    %c0_i32 = arith.constant 0 : i32
    %c0_i32_0 = arith.constant 0 : i32
    %c0_i32_1 = arith.constant 0 : i32
    return %c0_i32, %c0_i32_0 : i32, i32
  }
  func.func @transform_2(%arg0: i32) -> (i32, i32) {
    %c0_i32 = arith.constant 0 : i32
    %c0_i32_0 = arith.constant 0 : i32
    %c0_i32_1 = arith.constant 0 : i32
    return %c0_i32, %c0_i32_0 : i32, i32
  }
  func.func @transform_3(%arg0: i32) -> (i32, i32, i32) {
    %c0_i32 = arith.constant 0 : i32
    %c0_i32_0 = arith.constant 0 : i32
    %c0_i32_1 = arith.constant 0 : i32
    return %arg0, %c0_i32, %c0_i32_0 : i32, i32, i32
  }
}

module attributes {stable_mosaic.version = 11 : i64} {
  func.func @_ln_qkv_kernel(%arg0: i32, %arg1: i32, %arg2: memref<1x8x128xbf16, #tpu.memory_space<vmem>>, %arg3: memref<1x128xf32, #tpu.memory_space<vmem>>, %arg4: memref<1x128xf32, #tpu.memory_space<vmem>>, %arg5: memref<128x384xbf16, #tpu.memory_space<vmem>>, %arg6: memref<1x384xf32, #tpu.memory_space<vmem>>, %arg7: memref<1x8x384xbf16, #tpu.memory_space<vmem>>) attributes {dimension_semantics = [#tpu.dimension_semantics<parallel>, #tpu.dimension_semantics<parallel>], iteration_bounds = array<i64: 2, 2>, scalar_prefetch = 0 : i64, scratch_operands = 0 : i64, tpu.core_type = #tpu.core_type<tc>, window_params = [{transform_indices = @transform_0, window_bounds = array<i64: 1, 8, 128>}, {pipeline_mode = #tpu.pipeline_mode<synchronous>, transform_indices = @transform_1, window_bounds = array<i64: 1, 128>}, {pipeline_mode = #tpu.pipeline_mode<synchronous>, transform_indices = @transform_2, window_bounds = array<i64: 1, 128>}, {pipeline_mode = #tpu.pipeline_mode<synchronous>, transform_indices = @transform_3, window_bounds = array<i64: 128, 384>}, {pipeline_mode = #tpu.pipeline_mode<synchronous>, transform_indices = @transform_4, window_bounds = array<i64: 1, 384>}, {transform_indices = @transform_5, window_bounds = array<i64: 1, 8, 384>}]} {
    %c0 = arith.constant 0 : index
    %c0_0 = arith.constant 0 : index
    %c0_1 = arith.constant 0 : index
    %0 = vector.load %arg2[%c0, %c0_0, %c0_1] : memref<1x8x128xbf16, #tpu.memory_space<vmem>>, vector<1x8x128xbf16>
    %1 = vector.shape_cast %0 : vector<1x8x128xbf16> to vector<8x128xbf16>
    %2 = arith.extf %1 : vector<8x128xbf16> to vector<8x128xf32>
    %c0_2 = arith.constant 0 : index
    %c0_3 = arith.constant 0 : index
    %3 = vector.load %arg3[%c0_2, %c0_3] : memref<1x128xf32, #tpu.memory_space<vmem>>, vector<1x128xf32>
    %c0_4 = arith.constant 0 : index
    %c0_5 = arith.constant 0 : index
    %4 = vector.load %arg4[%c0_4, %c0_5] : memref<1x128xf32, #tpu.memory_space<vmem>>, vector<1x128xf32>
    %cst = arith.constant dense<0.000000e+00> : vector<8xf32>
    %5 = vector.multi_reduction <add>, %2, %cst [1] : vector<8x128xf32> to vector<8xf32>
    %6 = vector.shape_cast %5 : vector<8xf32> to vector<8x1xf32>
    %cst_6 = arith.constant 1.280000e+02 : f32
    %7 = vector.broadcast %cst_6 : f32 to vector<8x1xf32>
    %8 = arith.divf %6, %7 : vector<8x1xf32>
    %9 = vector.broadcast %8 : vector<8x1xf32> to vector<8x128xf32>
    %10 = arith.subf %2, %9 : vector<8x128xf32>
    %11 = arith.mulf %10, %10 : vector<8x128xf32>
    %cst_7 = arith.constant dense<0.000000e+00> : vector<8xf32>
    %12 = vector.multi_reduction <add>, %11, %cst_7 [1] : vector<8x128xf32> to vector<8xf32>
    %13 = vector.shape_cast %12 : vector<8xf32> to vector<8x1xf32>
    %cst_8 = arith.constant 1.280000e+02 : f32
    %14 = vector.broadcast %cst_8 : f32 to vector<8x1xf32>
    %15 = arith.divf %13, %14 : vector<8x1xf32>
    %16 = vector.broadcast %8 : vector<8x1xf32> to vector<8x128xf32>
    %17 = arith.subf %2, %16 : vector<8x128xf32>
    %cst_9 = arith.constant 9.99999997E-7 : f32
    %18 = vector.broadcast %cst_9 : f32 to vector<8x1xf32>
    %19 = arith.addf %15, %18 : vector<8x1xf32>
    %20 = math.rsqrt %19 : vector<8x1xf32>
    %21 = vector.broadcast %20 : vector<8x1xf32> to vector<8x128xf32>
    %22 = arith.mulf %17, %21 : vector<8x128xf32>
    %23 = vector.broadcast %3 : vector<1x128xf32> to vector<8x128xf32>
    %24 = arith.mulf %22, %23 : vector<8x128xf32>
    %25 = vector.broadcast %4 : vector<1x128xf32> to vector<8x128xf32>
    %26 = arith.addf %24, %25 : vector<8x128xf32>
    %27 = arith.truncf %26 : vector<8x128xf32> to vector<8x128xbf16>
    %c0_10 = arith.constant 0 : index
    %c0_11 = arith.constant 0 : index
    %28 = vector.load %arg5[%c0_10, %c0_11] : memref<128x384xbf16, #tpu.memory_space<vmem>>, vector<128x384xbf16>
    %cst_12 = arith.constant dense<0.000000e+00> : vector<8x384xf32>
    %29 = tpu.matmul %27, %28, %cst_12 {dimension_numbers = #tpu.dot_dimension_numbers<[1], [0], [0], [1], [0, 0, 1, 1], [], []>} : vector<8x128xbf16>, vector<128x384xbf16>, vector<8x384xf32> -> vector<8x384xf32>
    %c0_13 = arith.constant 0 : index
    %c0_14 = arith.constant 0 : index
    %30 = vector.load %arg6[%c0_13, %c0_14] : memref<1x384xf32, #tpu.memory_space<vmem>>, vector<1x384xf32>
    %31 = vector.broadcast %30 : vector<1x384xf32> to vector<8x384xf32>
    %32 = arith.addf %29, %31 : vector<8x384xf32>
    %33 = arith.truncf %32 : vector<8x384xf32> to vector<8x384xbf16>
    %c0_15 = arith.constant 0 : index
    %c0_16 = arith.constant 0 : index
    %c0_17 = arith.constant 0 : index
    %34 = vector.load %arg7[%c0_15, %c0_16, %c0_17] : memref<1x8x384xbf16, #tpu.memory_space<vmem>>, vector<1x8x384xbf16>
    %35 = vector.shape_cast %34 : vector<1x8x384xbf16> to vector<8x384xbf16>
    %36 = vector.shape_cast %33 : vector<8x384xbf16> to vector<1x8x384xbf16>
    tpu.vector_store %arg7[%c0_15, %c0_16, %c0_17], %36 {strides = array<i32>} : memref<1x8x384xbf16, #tpu.memory_space<vmem>>, vector<1x8x384xbf16>,
    return
  }
  func.func @transform_0(%arg0: i32, %arg1: i32) -> (i32, i32, i32) {
    %c0_i32 = arith.constant 0 : i32
    %c0_i32_0 = arith.constant 0 : i32
    return %arg0, %arg1, %c0_i32 : i32, i32, i32
  }
  func.func @transform_1(%arg0: i32, %arg1: i32) -> (i32, i32) {
    %c0_i32 = arith.constant 0 : i32
    %c0_i32_0 = arith.constant 0 : i32
    %c0_i32_1 = arith.constant 0 : i32
    return %c0_i32, %c0_i32_0 : i32, i32
  }
  func.func @transform_2(%arg0: i32, %arg1: i32) -> (i32, i32) {
    %c0_i32 = arith.constant 0 : i32
    %c0_i32_0 = arith.constant 0 : i32
    %c0_i32_1 = arith.constant 0 : i32
    return %c0_i32, %c0_i32_0 : i32, i32
  }
  func.func @transform_3(%arg0: i32, %arg1: i32) -> (i32, i32) {
    %c0_i32 = arith.constant 0 : i32
    %c0_i32_0 = arith.constant 0 : i32
    %c0_i32_1 = arith.constant 0 : i32
    return %c0_i32, %c0_i32_0 : i32, i32
  }
  func.func @transform_4(%arg0: i32, %arg1: i32) -> (i32, i32) {
    %c0_i32 = arith.constant 0 : i32
    %c0_i32_0 = arith.constant 0 : i32
    %c0_i32_1 = arith.constant 0 : i32
    return %c0_i32, %c0_i32_0 : i32, i32
  }
  func.func @transform_5(%arg0: i32, %arg1: i32) -> (i32, i32, i32) {
    %c0_i32 = arith.constant 0 : i32
    %c0_i32_0 = arith.constant 0 : i32
    return %arg0, %arg1, %c0_i32 : i32, i32, i32
  }
}

module attributes {stable_mosaic.version = 11 : i64} {
  func.func @_attn_kernel(%arg0: i32, %arg1: i32, %arg2: memref<1x4x8x32xbf16, #tpu.memory_space<vmem>>, %arg3: memref<1x4x16x32xbf16, #tpu.memory_space<vmem>>, %arg4: memref<1x4x16x32xbf16, #tpu.memory_space<vmem>>, %arg5: memref<1x4x8x32xbf16, #tpu.memory_space<vmem>>) attributes {dimension_semantics = [#tpu.dimension_semantics<parallel>, #tpu.dimension_semantics<parallel>], iteration_bounds = array<i64: 2, 2>, scalar_prefetch = 0 : i64, scratch_operands = 0 : i64, tpu.core_type = #tpu.core_type<tc>, window_params = [{transform_indices = @transform_0, window_bounds = array<i64: 1, 4, 8, 32>}, {transform_indices = @transform_1, window_bounds = array<i64: 1, 4, 16, 32>}, {transform_indices = @transform_2, window_bounds = array<i64: 1, 4, 16, 32>}, {transform_indices = @transform_3, window_bounds = array<i64: 1, 4, 8, 32>}]} {
    %c0 = arith.constant 0 : index
    %c0_0 = arith.constant 0 : index
    %c0_1 = arith.constant 0 : index
    %c0_2 = arith.constant 0 : index
    %0 = vector.load %arg2[%c0, %c0_0, %c0_1, %c0_2] : memref<1x4x8x32xbf16, #tpu.memory_space<vmem>>, vector<1x4x8x32xbf16>
    %1 = vector.shape_cast %0 : vector<1x4x8x32xbf16> to vector<4x8x32xbf16>
    %c0_3 = arith.constant 0 : index
    %c0_4 = arith.constant 0 : index
    %c0_5 = arith.constant 0 : index
    %c0_6 = arith.constant 0 : index
    %2 = vector.load %arg3[%c0_3, %c0_4, %c0_5, %c0_6] : memref<1x4x16x32xbf16, #tpu.memory_space<vmem>>, vector<1x4x16x32xbf16>
    %3 = vector.shape_cast %2 : vector<1x4x16x32xbf16> to vector<4x16x32xbf16>
    %c0_7 = arith.constant 0 : index
    %c0_8 = arith.constant 0 : index
    %c0_9 = arith.constant 0 : index
    %c0_10 = arith.constant 0 : index
    %4 = vector.load %arg4[%c0_7, %c0_8, %c0_9, %c0_10] : memref<1x4x16x32xbf16, #tpu.memory_space<vmem>>, vector<1x4x16x32xbf16>
    %5 = vector.shape_cast %4 : vector<1x4x16x32xbf16> to vector<4x16x32xbf16>
    %cst = arith.constant dense<0.000000e+00> : vector<4x8x16xf32>
    %6 = tpu.matmul %1, %3, %cst {dimension_numbers = #tpu.dot_dimension_numbers<[2], [2], [1], [1], [0, 0, 0, 1, 1, 1], [0], [0]>} : vector<4x8x32xbf16>, vector<4x16x32xbf16>, vector<4x8x16xf32> -> vector<4x8x16xf32>
    %cst_11 = arith.constant 0.176776692 : f32
    %7 = vector.broadcast %cst_11 : f32 to vector<4x8x16xf32>
    %8 = arith.mulf %6, %7 : vector<4x8x16xf32>
    %9 = tpu.iota {dimensions = array<i32: 2>} : vector<4x8x16xi32>
    %c9_i32 = arith.constant 9 : i32
    %10 = vector.broadcast %c9_i32 : i32 to vector<4x8x16xi32>
    %11 = arith.cmpi slt, %9, %10 : vector<4x8x16xi32>
    %cst_12 = arith.constant -1.000000e+30 : f32
    %12 = vector.broadcast %cst_12 : f32 to vector<4x8x16xf32>
    %13 = arith.select %11, %8, %12 : vector<4x8x16xi1>, vector<4x8x16xf32>
    %cst_13 = arith.constant dense<0xFF800000> : vector<4x8xf32>
    %14 = vector.multi_reduction <maximumf>, %13, %cst_13 [2] : vector<4x8x16xf32> to vector<4x8xf32>
    %15 = vector.shape_cast %14 : vector<4x8xf32> to vector<4x8x1xf32>
    %16 = vector.broadcast %15 : vector<4x8x1xf32> to vector<4x8x16xf32>
    %17 = arith.subf %13, %16 : vector<4x8x16xf32>
    %18 = math.exp %17 : vector<4x8x16xf32>
    %cst_14 = arith.constant dense<0.000000e+00> : vector<4x8xf32>
    %19 = vector.multi_reduction <add>, %18, %cst_14 [2] : vector<4x8x16xf32> to vector<4x8xf32>
    %20 = vector.shape_cast %19 : vector<4x8xf32> to vector<4x8x1xf32>
    %21 = tpu.reciprocal %20 {approx = true} : vector<4x8x1xf32> -> vector<4x8x1xf32>
    %22 = vector.broadcast %21 : vector<4x8x1xf32> to vector<4x8x16xf32>
    %23 = arith.mulf %18, %22 : vector<4x8x16xf32>
    %24 = arith.truncf %23 : vector<4x8x16xf32> to vector<4x8x16xbf16>
    %cst_15 = arith.constant dense<0.000000e+00> : vector<4x8x32xf32>
    %25 = tpu.matmul %24, %5, %cst_15 {dimension_numbers = #tpu.dot_dimension_numbers<[2], [1], [1], [2], [0, 0, 0, 1, 1, 2], [0], [0]>} : vector<4x8x16xbf16>, vector<4x16x32xbf16>, vector<4x8x32xf32> -> vector<4x8x32xf32>
    %26 = arith.truncf %25 : vector<4x8x32xf32> to vector<4x8x32xbf16>
    %c0_16 = arith.constant 0 : index
    %c0_17 = arith.constant 0 : index
    %c0_18 = arith.constant 0 : index
    %c0_19 = arith.constant 0 : index
    %27 = vector.load %arg5[%c0_16, %c0_17, %c0_18, %c0_19] : memref<1x4x8x32xbf16, #tpu.memory_space<vmem>>, vector<1x4x8x32xbf16>
    %28 = vector.shape_cast %27 : vector<1x4x8x32xbf16> to vector<4x8x32xbf16>
    %29 = vector.shape_cast %26 : vector<4x8x32xbf16> to vector<1x4x8x32xbf16>
    tpu.vector_store %arg5[%c0_16, %c0_17, %c0_18, %c0_19], %29 {strides = array<i32>} : memref<1x4x8x32xbf16, #tpu.memory_space<vmem>>, vector<1x4x8x32xbf16>,
    return
  }
  func.func @transform_0(%arg0: i32, %arg1: i32) -> (i32, i32, i32, i32) {
    %c0_i32 = arith.constant 0 : i32
    %c0_i32_0 = arith.constant 0 : i32
    %c0_i32_1 = arith.constant 0 : i32
    return %arg0, %c0_i32, %arg1, %c0_i32_0 : i32, i32, i32, i32
  }
  func.func @transform_1(%arg0: i32, %arg1: i32) -> (i32, i32, i32, i32) {
    %c0_i32 = arith.constant 0 : i32
    %c0_i32_0 = arith.constant 0 : i32
    %c0_i32_1 = arith.constant 0 : i32
    %c0_i32_2 = arith.constant 0 : i32
    return %arg0, %c0_i32, %c0_i32_0, %c0_i32_1 : i32, i32, i32, i32
  }
  func.func @transform_2(%arg0: i32, %arg1: i32) -> (i32, i32, i32, i32) {
    %c0_i32 = arith.constant 0 : i32
    %c0_i32_0 = arith.constant 0 : i32
    %c0_i32_1 = arith.constant 0 : i32
    %c0_i32_2 = arith.constant 0 : i32
    return %arg0, %c0_i32, %c0_i32_0, %c0_i32_1 : i32, i32, i32, i32
  }
  func.func @transform_3(%arg0: i32, %arg1: i32) -> (i32, i32, i32, i32) {
    %c0_i32 = arith.constant 0 : i32
    %c0_i32_0 = arith.constant 0 : i32
    %c0_i32_1 = arith.constant 0 : i32
    return %arg0, %c0_i32, %arg1, %c0_i32_0 : i32, i32, i32, i32
  }
}

module attributes {stable_mosaic.version = 11 : i64} {
  func.func @_proj_mlp_kernel(%arg0: i32, %arg1: i32, %arg2: memref<1x8x128xbf16, #tpu.memory_space<vmem>>, %arg3: memref<1x8x128xbf16, #tpu.memory_space<vmem>>, %arg4: memref<128x128xbf16, #tpu.memory_space<vmem>>, %arg5: memref<1x128xf32, #tpu.memory_space<vmem>>, %arg6: memref<1x128xf32, #tpu.memory_space<vmem>>, %arg7: memref<1x128xf32, #tpu.memory_space<vmem>>, %arg8: memref<128x256xbf16, #tpu.memory_space<vmem>>, %arg9: memref<1x256xf32, #tpu.memory_space<vmem>>, %arg10: memref<256x128xbf16, #tpu.memory_space<vmem>>, %arg11: memref<1x128xf32, #tpu.memory_space<vmem>>, %arg12: memref<1x8x128xbf16, #tpu.memory_space<vmem>>) attributes {dimension_semantics = [#tpu.dimension_semantics<parallel>, #tpu.dimension_semantics<parallel>], iteration_bounds = array<i64: 2, 2>, scalar_prefetch = 0 : i64, scratch_operands = 0 : i64, tpu.core_type = #tpu.core_type<tc>, window_params = [{transform_indices = @transform_0, window_bounds = array<i64: 1, 8, 128>}, {transform_indices = @transform_1, window_bounds = array<i64: 1, 8, 128>}, {pipeline_mode = #tpu.pipeline_mode<synchronous>, transform_indices = @transform_2, window_bounds = array<i64: 128, 128>}, {pipeline_mode = #tpu.pipeline_mode<synchronous>, transform_indices = @transform_3, window_bounds = array<i64: 1, 128>}, {pipeline_mode = #tpu.pipeline_mode<synchronous>, transform_indices = @transform_4, window_bounds = array<i64: 1, 128>}, {pipeline_mode = #tpu.pipeline_mode<synchronous>, transform_indices = @transform_5, window_bounds = array<i64: 1, 128>}, {pipeline_mode = #tpu.pipeline_mode<synchronous>, transform_indices = @transform_6, window_bounds = array<i64: 128, 256>}, {pipeline_mode = #tpu.pipeline_mode<synchronous>, transform_indices = @transform_7, window_bounds = array<i64: 1, 256>}, {pipeline_mode = #tpu.pipeline_mode<synchronous>, transform_indices = @transform_8, window_bounds = array<i64: 256, 128>}, {pipeline_mode = #tpu.pipeline_mode<synchronous>, transform_indices = @transform_9, window_bounds = array<i64: 1, 128>}, {transform_indices = @transform_10, window_bounds = array<i64: 1, 8, 128>}]} {
    %c0 = arith.constant 0 : index
    %c0_0 = arith.constant 0 : index
    %c0_1 = arith.constant 0 : index
    %0 = vector.load %arg2[%c0, %c0_0, %c0_1] : memref<1x8x128xbf16, #tpu.memory_space<vmem>>, vector<1x8x128xbf16>
    %1 = vector.shape_cast %0 : vector<1x8x128xbf16> to vector<8x128xbf16>
    %2 = arith.extf %1 : vector<8x128xbf16> to vector<8x128xf32>
    %c0_2 = arith.constant 0 : index
    %c0_3 = arith.constant 0 : index
    %c0_4 = arith.constant 0 : index
    %3 = vector.load %arg3[%c0_2, %c0_3, %c0_4] : memref<1x8x128xbf16, #tpu.memory_space<vmem>>, vector<1x8x128xbf16>
    %4 = vector.shape_cast %3 : vector<1x8x128xbf16> to vector<8x128xbf16>
    %c0_5 = arith.constant 0 : index
    %c0_6 = arith.constant 0 : index
    %5 = vector.load %arg4[%c0_5, %c0_6] : memref<128x128xbf16, #tpu.memory_space<vmem>>, vector<128x128xbf16>
    %cst = arith.constant dense<0.000000e+00> : vector<8x128xf32>
    %6 = tpu.matmul %4, %5, %cst {dimension_numbers = #tpu.dot_dimension_numbers<[1], [0], [0], [1], [0, 0, 1, 1], [], []>} : vector<8x128xbf16>, vector<128x128xbf16>, vector<8x128xf32> -> vector<8x128xf32>
    %c0_7 = arith.constant 0 : index
    %c0_8 = arith.constant 0 : index
    %7 = vector.load %arg5[%c0_7, %c0_8] : memref<1x128xf32, #tpu.memory_space<vmem>>, vector<1x128xf32>
    %8 = vector.broadcast %7 : vector<1x128xf32> to vector<8x128xf32>
    %9 = arith.addf %6, %8 : vector<8x128xf32>
    %10 = arith.addf %2, %9 : vector<8x128xf32>
    %c0_9 = arith.constant 0 : index
    %c0_10 = arith.constant 0 : index
    %11 = vector.load %arg6[%c0_9, %c0_10] : memref<1x128xf32, #tpu.memory_space<vmem>>, vector<1x128xf32>
    %c0_11 = arith.constant 0 : index
    %c0_12 = arith.constant 0 : index
    %12 = vector.load %arg7[%c0_11, %c0_12] : memref<1x128xf32, #tpu.memory_space<vmem>>, vector<1x128xf32>
    %cst_13 = arith.constant dense<0.000000e+00> : vector<8xf32>
    %13 = vector.multi_reduction <add>, %10, %cst_13 [1] : vector<8x128xf32> to vector<8xf32>
    %14 = vector.shape_cast %13 : vector<8xf32> to vector<8x1xf32>
    %cst_14 = arith.constant 1.280000e+02 : f32
    %15 = vector.broadcast %cst_14 : f32 to vector<8x1xf32>
    %16 = arith.divf %14, %15 : vector<8x1xf32>
    %17 = vector.broadcast %16 : vector<8x1xf32> to vector<8x128xf32>
    %18 = arith.subf %10, %17 : vector<8x128xf32>
    %19 = arith.mulf %18, %18 : vector<8x128xf32>
    %cst_15 = arith.constant dense<0.000000e+00> : vector<8xf32>
    %20 = vector.multi_reduction <add>, %19, %cst_15 [1] : vector<8x128xf32> to vector<8xf32>
    %21 = vector.shape_cast %20 : vector<8xf32> to vector<8x1xf32>
    %cst_16 = arith.constant 1.280000e+02 : f32
    %22 = vector.broadcast %cst_16 : f32 to vector<8x1xf32>
    %23 = arith.divf %21, %22 : vector<8x1xf32>
    %24 = vector.broadcast %16 : vector<8x1xf32> to vector<8x128xf32>
    %25 = arith.subf %10, %24 : vector<8x128xf32>
    %cst_17 = arith.constant 9.99999997E-7 : f32
    %26 = vector.broadcast %cst_17 : f32 to vector<8x1xf32>
    %27 = arith.addf %23, %26 : vector<8x1xf32>
    %28 = math.rsqrt %27 : vector<8x1xf32>
    %29 = vector.broadcast %28 : vector<8x1xf32> to vector<8x128xf32>
    %30 = arith.mulf %25, %29 : vector<8x128xf32>
    %31 = vector.broadcast %11 : vector<1x128xf32> to vector<8x128xf32>
    %32 = arith.mulf %30, %31 : vector<8x128xf32>
    %33 = vector.broadcast %12 : vector<1x128xf32> to vector<8x128xf32>
    %34 = arith.addf %32, %33 : vector<8x128xf32>
    %35 = arith.truncf %34 : vector<8x128xf32> to vector<8x128xbf16>
    %c0_18 = arith.constant 0 : index
    %c0_19 = arith.constant 0 : index
    %36 = vector.load %arg8[%c0_18, %c0_19] : memref<128x256xbf16, #tpu.memory_space<vmem>>, vector<128x256xbf16>
    %cst_20 = arith.constant dense<0.000000e+00> : vector<8x256xf32>
    %37 = tpu.matmul %35, %36, %cst_20 {dimension_numbers = #tpu.dot_dimension_numbers<[1], [0], [0], [1], [0, 0, 1, 1], [], []>} : vector<8x128xbf16>, vector<128x256xbf16>, vector<8x256xf32> -> vector<8x256xf32>
    %c0_21 = arith.constant 0 : index
    %c0_22 = arith.constant 0 : index
    %38 = vector.load %arg9[%c0_21, %c0_22] : memref<1x256xf32, #tpu.memory_space<vmem>>, vector<1x256xf32>
    %39 = vector.broadcast %38 : vector<1x256xf32> to vector<8x256xf32>
    %40 = arith.addf %37, %39 : vector<8x256xf32>
    %cst_23 = arith.constant 5.000000e-01 : f32
    %41 = vector.broadcast %cst_23 : f32 to vector<8x256xf32>
    %42 = arith.mulf %41, %40 : vector<8x256xf32>
    %cst_24 = arith.constant 0.797884583 : f32
    %43 = vector.broadcast %cst_24 : f32 to vector<8x256xf32>
    %44 = arith.mulf %43, %40 : vector<8x256xf32>
    %cst_25 = arith.constant 4.471500e-02 : f32
    %45 = vector.broadcast %cst_25 : f32 to vector<8x256xf32>
    %46 = arith.mulf %45, %40 : vector<8x256xf32>
    %47 = arith.mulf %46, %40 : vector<8x256xf32>
    %cst_26 = arith.constant 1.000000e+00 : f32
    %48 = vector.broadcast %cst_26 : f32 to vector<8x256xf32>
    %49 = arith.addf %48, %47 : vector<8x256xf32>
    %50 = arith.mulf %44, %49 : vector<8x256xf32>
    %51 = math.tanh %50 : vector<8x256xf32>
    %cst_27 = arith.constant 1.000000e+00 : f32
    %52 = vector.broadcast %cst_27 : f32 to vector<8x256xf32>
    %53 = arith.addf %52, %51 : vector<8x256xf32>
    %54 = arith.mulf %42, %53 : vector<8x256xf32>
    %55 = arith.truncf %54 : vector<8x256xf32> to vector<8x256xbf16>
    %c0_28 = arith.constant 0 : index
    %c0_29 = arith.constant 0 : index
    %56 = vector.load %arg10[%c0_28, %c0_29] : memref<256x128xbf16, #tpu.memory_space<vmem>>, vector<256x128xbf16>
    %cst_30 = arith.constant dense<0.000000e+00> : vector<8x128xf32>
    %57 = tpu.matmul %55, %56, %cst_30 {dimension_numbers = #tpu.dot_dimension_numbers<[1], [0], [0], [1], [0, 0, 1, 1], [], []>} : vector<8x256xbf16>, vector<256x128xbf16>, vector<8x128xf32> -> vector<8x128xf32>
    %c0_31 = arith.constant 0 : index
    %c0_32 = arith.constant 0 : index
    %58 = vector.load %arg11[%c0_31, %c0_32] : memref<1x128xf32, #tpu.memory_space<vmem>>, vector<1x128xf32>
    %59 = vector.broadcast %58 : vector<1x128xf32> to vector<8x128xf32>
    %60 = arith.addf %57, %59 : vector<8x128xf32>
    %61 = arith.addf %10, %60 : vector<8x128xf32>
    %62 = arith.truncf %61 : vector<8x128xf32> to vector<8x128xbf16>
    %c0_33 = arith.constant 0 : index
    %c0_34 = arith.constant 0 : index
    %c0_35 = arith.constant 0 : index
    %63 = vector.load %arg12[%c0_33, %c0_34, %c0_35] : memref<1x8x128xbf16, #tpu.memory_space<vmem>>, vector<1x8x128xbf16>
    %64 = vector.shape_cast %63 : vector<1x8x128xbf16> to vector<8x128xbf16>
    %65 = vector.shape_cast %62 : vector<8x128xbf16> to vector<1x8x128xbf16>
    tpu.vector_store %arg12[%c0_33, %c0_34, %c0_35], %65 {strides = array<i32>} : memref<1x8x128xbf16, #tpu.memory_space<vmem>>, vector<1x8x128xbf16>,
    return
  }
  func.func @transform_0(%arg0: i32, %arg1: i32) -> (i32, i32, i32) {
    %c0_i32 = arith.constant 0 : i32
    %c0_i32_0 = arith.constant 0 : i32
    return %arg0, %arg1, %c0_i32 : i32, i32, i32
  }
  func.func @transform_1(%arg0: i32, %arg1: i32) -> (i32, i32, i32) {
    %c0_i32 = arith.constant 0 : i32
    %c0_i32_0 = arith.constant 0 : i32
    return %arg0, %arg1, %c0_i32 : i32, i32, i32
  }
  func.func @transform_2(%arg0: i32, %arg1: i32) -> (i32, i32) {
    %c0_i32 = arith.constant 0 : i32
    %c0_i32_0 = arith.constant 0 : i32
    %c0_i32_1 = arith.constant 0 : i32
    return %c0_i32, %c0_i32_0 : i32, i32
  }
  func.func @transform_3(%arg0: i32, %arg1: i32) -> (i32, i32) {
    %c0_i32 = arith.constant 0 : i32
    %c0_i32_0 = arith.constant 0 : i32
    %c0_i32_1 = arith.constant 0 : i32
    return %c0_i32, %c0_i32_0 : i32, i32
  }
  func.func @transform_4(%arg0: i32, %arg1: i32) -> (i32, i32) {
    %c0_i32 = arith.constant 0 : i32
    %c0_i32_0 = arith.constant 0 : i32
    %c0_i32_1 = arith.constant 0 : i32
    return %c0_i32, %c0_i32_0 : i32, i32
  }
  func.func @transform_5(%arg0: i32, %arg1: i32) -> (i32, i32) {
    %c0_i32 = arith.constant 0 : i32
    %c0_i32_0 = arith.constant 0 : i32
    %c0_i32_1 = arith.constant 0 : i32
    return %c0_i32, %c0_i32_0 : i32, i32
  }
  func.func @transform_6(%arg0: i32, %arg1: i32) -> (i32, i32) {
    %c0_i32 = arith.constant 0 : i32
    %c0_i32_0 = arith.constant 0 : i32
    %c0_i32_1 = arith.constant 0 : i32
    return %c0_i32, %c0_i32_0 : i32, i32
  }
  func.func @transform_7(%arg0: i32, %arg1: i32) -> (i32, i32) {
    %c0_i32 = arith.constant 0 : i32
    %c0_i32_0 = arith.constant 0 : i32
    %c0_i32_1 = arith.constant 0 : i32
    return %c0_i32, %c0_i32_0 : i32, i32
  }
  func.func @transform_8(%arg0: i32, %arg1: i32) -> (i32, i32) {
    %c0_i32 = arith.constant 0 : i32
    %c0_i32_0 = arith.constant 0 : i32
    %c0_i32_1 = arith.constant 0 : i32
    return %c0_i32, %c0_i32_0 : i32, i32
  }
  func.func @transform_9(%arg0: i32, %arg1: i32) -> (i32, i32) {
    %c0_i32 = arith.constant 0 : i32
    %c0_i32_0 = arith.constant 0 : i32
    %c0_i32_1 = arith.constant 0 : i32
    return %c0_i32, %c0_i32_0 : i32, i32
  }
  func.func @transform_10(%arg0: i32, %arg1: i32) -> (i32, i32, i32) {
    %c0_i32 = arith.constant 0 : i32
    %c0_i32_0 = arith.constant 0 : i32
    return %arg0, %arg1, %c0_i32 : i32, i32, i32
  }
}

module attributes {stable_mosaic.version = 11 : i64} {
  func.func @_head_kernel(%arg0: memref<2x128xbf16, #tpu.memory_space<vmem>>, %arg1: memref<1x128xf32, #tpu.memory_space<vmem>>, %arg2: memref<1x128xf32, #tpu.memory_space<vmem>>, %arg3: memref<128x2xbf16, #tpu.memory_space<vmem>>, %arg4: memref<1x2xf32, #tpu.memory_space<vmem>>, %arg5: memref<2x2xf32, #tpu.memory_space<vmem>>) attributes {dimension_semantics = [], scalar_prefetch = 0 : i64, scratch_operands = 0 : i64, tpu.core_type = #tpu.core_type<tc>} {
    %c0 = arith.constant 0 : index
    %c0_0 = arith.constant 0 : index
    %0 = vector.load %arg0[%c0, %c0_0] : memref<2x128xbf16, #tpu.memory_space<vmem>>, vector<2x128xbf16>
    %1 = arith.extf %0 : vector<2x128xbf16> to vector<2x128xf32>
    %c0_1 = arith.constant 0 : index
    %c0_2 = arith.constant 0 : index
    %2 = vector.load %arg1[%c0_1, %c0_2] : memref<1x128xf32, #tpu.memory_space<vmem>>, vector<1x128xf32>
    %c0_3 = arith.constant 0 : index
    %c0_4 = arith.constant 0 : index
    %3 = vector.load %arg2[%c0_3, %c0_4] : memref<1x128xf32, #tpu.memory_space<vmem>>, vector<1x128xf32>
    %cst = arith.constant dense<0.000000e+00> : vector<2xf32>
    %4 = vector.multi_reduction <add>, %1, %cst [1] : vector<2x128xf32> to vector<2xf32>
    %5 = vector.shape_cast %4 : vector<2xf32> to vector<2x1xf32>
    %cst_5 = arith.constant 1.280000e+02 : f32
    %6 = vector.broadcast %cst_5 : f32 to vector<2x1xf32>
    %7 = arith.divf %5, %6 : vector<2x1xf32>
    %8 = vector.broadcast %7 : vector<2x1xf32> to vector<2x128xf32>
    %9 = arith.subf %1, %8 : vector<2x128xf32>
    %10 = arith.mulf %9, %9 : vector<2x128xf32>
    %cst_6 = arith.constant dense<0.000000e+00> : vector<2xf32>
    %11 = vector.multi_reduction <add>, %10, %cst_6 [1] : vector<2x128xf32> to vector<2xf32>
    %12 = vector.shape_cast %11 : vector<2xf32> to vector<2x1xf32>
    %cst_7 = arith.constant 1.280000e+02 : f32
    %13 = vector.broadcast %cst_7 : f32 to vector<2x1xf32>
    %14 = arith.divf %12, %13 : vector<2x1xf32>
    %15 = vector.broadcast %7 : vector<2x1xf32> to vector<2x128xf32>
    %16 = arith.subf %1, %15 : vector<2x128xf32>
    %cst_8 = arith.constant 9.99999997E-7 : f32
    %17 = vector.broadcast %cst_8 : f32 to vector<2x1xf32>
    %18 = arith.addf %14, %17 : vector<2x1xf32>
    %19 = math.rsqrt %18 : vector<2x1xf32>
    %20 = vector.broadcast %19 : vector<2x1xf32> to vector<2x128xf32>
    %21 = arith.mulf %16, %20 : vector<2x128xf32>
    %22 = vector.broadcast %2 : vector<1x128xf32> to vector<2x128xf32>
    %23 = arith.mulf %21, %22 : vector<2x128xf32>
    %24 = vector.broadcast %3 : vector<1x128xf32> to vector<2x128xf32>
    %25 = arith.addf %23, %24 : vector<2x128xf32>
    %26 = arith.truncf %25 : vector<2x128xf32> to vector<2x128xbf16>
    %c0_9 = arith.constant 0 : index
    %c0_10 = arith.constant 0 : index
    %27 = vector.load %arg3[%c0_9, %c0_10] : memref<128x2xbf16, #tpu.memory_space<vmem>>, vector<128x2xbf16>
    %cst_11 = arith.constant dense<0.000000e+00> : vector<2x2xf32>
    %28 = tpu.matmul %26, %27, %cst_11 {dimension_numbers = #tpu.dot_dimension_numbers<[1], [0], [0], [1], [0, 0, 1, 1], [], []>} : vector<2x128xbf16>, vector<128x2xbf16>, vector<2x2xf32> -> vector<2x2xf32>
    %c0_12 = arith.constant 0 : index
    %c0_13 = arith.constant 0 : index
    %29 = vector.load %arg4[%c0_12, %c0_13] : memref<1x2xf32, #tpu.memory_space<vmem>>, vector<1x2xf32>
    %30 = vector.broadcast %29 : vector<1x2xf32> to vector<2x2xf32>
    %31 = arith.addf %28, %30 : vector<2x2xf32>
    %c0_14 = arith.constant 0 : index
    %c0_15 = arith.constant 0 : index
    %32 = vector.load %arg5[%c0_14, %c0_15] : memref<2x2xf32, #tpu.memory_space<vmem>>, vector<2x2xf32>
    tpu.vector_store %arg5[%c0_14, %c0_15], %31 {strides = array<i32>} : memref<2x2xf32, #tpu.memory_space<vmem>>, vector<2x2xf32>,
    return
  }
}

</mosaic_0001>

<bundles_post_ra>
// kernel: model_forward.9
= control target key start
LH: loop header
LB: loop body
LE: loop exit
PB: predicated region body
PF: predicated region fallthrough
CT: control target
= control target key end

     0   :  { %s876_s18 = smov 0   ;;  %s878_s19 = smov 0   ;;  %s1016_s0 = inlined_call_operand.vmem [shape: bf16[2,16,128], index: 0, kind: input, shape index: {}]   ;;  %s1017_s1 = inlined_call_operand.vmem [shape: f32[1,128], index: 1, kind: input, shape index: {}]   ;;  %s1018_s2 = inlined_call_operand.vmem [shape: f32[1,128], index: 2, kind: input, shape index: {}]   ;;  %s1019_s3 = inlined_call_operand.vmem [shape: bf16[128,384], index: 3, kind: input, shape index: {}]   ;;  %s1020_s4 = inlined_call_operand.vmem [shape: f32[1,384], index: 4, kind: input, shape index: {}]   ;;  %s1021_s5 = inlined_call_operand.vmem [shape: bf16[2,16,384], index: 5, kind: output, shape index: {}]  }
   0x1   :  { %s880_s20 = smov 0   ;;  %s882_s21 = smov 0  }
   0x2   :  { %s884_s22 = smov 0  }
   0x3 LB: > { %s24_s23 = sadd.s32 1, %s833_s20  ;;  %s27_s24 = sadd.s32 1, %s837_s21  ;;  %s841_s22 = sphi %s884_s22, %s15_s22   ;;  %s837_s21 = sphi %s882_s21, %s1025_s21   ;;  %s833_s20 = sphi %s880_s20, %s1024_s20   ;;  %s829_s19 = sphi %s878_s19, %s1023_s19   ;;  %s825_s18 = sphi %s876_s18, %s1022_s18  }
   0x4   : > { %p25_p0 = scmp.ge.s32.totalorder %s24_s23, 2  ;;  %p659_p1 = scmp.ge.s32.totalorder %s841_s22, 1 }
   0x5   : > { %p206_p2 = scmp.lt.s32.totalorder %s841_s22, 5 }
   0x6   : > { %s1027_s23 = smov (%p25_p0, %s24_s23), 0  ;;  %s1029_s24 = smov (!%p25_p0, %s27_s24), %s837_s21 }
   0x7   : > { %p207_p3 = pnand %p659_p1, %p206_p2  ;;  %p29_p4 = scmp.ge.s32.totalorder %s1029_s24, 2 }
   0x8   : > { %p241_p5 = scmp.lt.s32.totalorder (!%p207_p3), %s829_s19, 1  ;;  %p243_p6 = scmp.lt.s32.totalorder (!%p207_p3), %s825_s18, 1  ;;  %v769_v2 = vld [vmem:[%s1019_s3 + $0x4] ss:$12 sps:$4 sm:$0xff] (!%p207_p3)   ;;  %v771_v3 = vld [vmem:[%s1019_s3] ss:$12 sps:$4 sm:$0xff] (!%p207_p3)   ;;  %v324_v42 = vlaneseq (!%p207_p3) }
   0x9   : > { %s1031_s24 = smov (%p29_p4, %s1029_s24), 0  ;;  %210 = sbr.rel (%p207_p3) target bundleno = 555 (0x22b), region = 40 }
   0xa   : > { %v843_v4 = vmov (!%p207_p3), 0.0   ;;  %v772_v5 = vld [vmem:[%s1019_s3 + $0x8] ss:$12 sps:$4 sm:$0xff] (!%p207_p3)   ;;  %467 = vmatprep.subr.bf16.mxu0 (!%p207_p3), %v769_v2  ;;  %v775_v7 = vld [vmem:[%s1019_s3 + $0x18] ss:$12 sps:$4 sm:$0xff] (!%p207_p3)   ;;  %v844_v26 = vmov (!%p207_p3), 0  }
   0xb   : > { %704 = vmatprep.subr.bf16.mxu1 (!%p207_p3), %v843_v4  ;;  %v773_v6 = vld [vmem:[%s1019_s3 + $0x1c] ss:$12 sps:$4 sm:$0xff] (!%p207_p3)   ;;  %468 = vmatpush1.bf16.msra.mxu0 (!%p207_p3), %v771_v3  ;;  %v776_v8 = vld [vmem:[%s1019_s3 + $0x20] ss:$12 sps:$4 sm:$0xff] (!%p207_p3)   ;;  %v780_v15 = vld [vmem:[%s1019_s3 + $0x38] ss:$12 sps:$4 sm:$0xff] (!%p207_p3)  }
   0xc   : > { %705 = vmatpush3.bf16.msra.mxu1 (!%p207_p3), %v772_v5  ;;  %469 = vmatprep.subr.bf16.mxu0 (!%p207_p3), %v773_v6  ;;  %v777_v9 = vld [vmem:[%s1019_s3 + $0x34] ss:$12 sps:$4 sm:$0xff] (!%p207_p3)   ;;  %v779_v14 = vld [vmem:[%s1019_s3 + $0x30] ss:$12 sps:$4 sm:$0xff] (!%p207_p3)   ;;  %v781_v16 = vld [vmem:[%s1019_s3 + $0x4c] ss:$12 sps:$4 sm:$0xff] (!%p207_p3)  }
   0xd   : > { %706 = vmatprep.subr.bf16.mxu1 (!%p207_p3), %v843_v4  ;;  %v783_v17 = vld [vmem:[%s1019_s3 + $0x48] ss:$12 sps:$4 sm:$0xff] (!%p207_p3)   ;;  %v784_v18 = vld [vmem:[%s1019_s3 + $0x50] ss:$12 sps:$4 sm:$0xff] (!%p207_p3)   ;;  %v787_v20 = vld [vmem:[%s1019_s3 + $0x60] ss:$12 sps:$4 sm:$0xff] (!%p207_p3)   ;;  %499 = vmatprep.mubr.bf16.mxu0 (!%p207_p3), %v844_v26 }
   0xe   : > { %v785_v19 = vld [vmem:[%s1019_s3 + $0x64] ss:$12 sps:$4 sm:$0xff] (!%p207_p3)   ;;  %v788_v21 = vld [vmem:[%s1019_s3 + $0x68] ss:$12 sps:$4 sm:$0xff] (!%p207_p3)   ;;  %v792_v24 = vld [vmem:[%s1019_s3 + $0x80] ss:$12 sps:$4 sm:$0xff] (!%p207_p3)  }
   0xf   : > { %470 = vmatpush1.bf16.msra.mxu0 (!%p207_p3), %v775_v7  ;;  %v789_v22 = vld [vmem:[%s1019_s3 + $0x7c] ss:$12 sps:$4 sm:$0xff] (!%p207_p3)   ;;  %v791_v23 = vld [vmem:[%s1019_s3 + $0x78] ss:$12 sps:$4 sm:$0xff] (!%p207_p3)   ;;  %v793_v25 = vld [vmem:[%s1019_s3 + $0x94] ss:$12 sps:$4 sm:$0xff] (!%p207_p3)  }
  0x10   : > { %s1033_s19 = smov (!%p241_p5, %s829_s19), 1  ;;  %s1035_s18 = smov (!%p243_p6, %s825_s18), 1  ;;  %707 = vmatpush3.bf16.msra.mxu1 %v776_v8  ;;  %471 = vmatprep.subr.bf16.mxu0 %v777_v9  ;;  %vm845_vm0 = vmmov 0   ;;  %v795_v27 = vld [vmem:[%s1019_s3 + $0x90] ss:$12 sps:$4 sm:$0xff]   ;;  %v325_v43 = vshrl.u32 %v324_v42, 7 }
  0x11   : > { %s660_s25 = sshll.u32 %s1033_s19, 1  ;;  %708 = vmatprep.subr.bf16.mxu1 %v843_v4  ;;  %720 = vmatprep.mubr.msk.bf16.mxu1 %vm845_vm0, %v843_v4  ;;  %v796_v28 = vld [vmem:[%s1019_s3 + $0x98] ss:$12 sps:$4 sm:$0xff]   ;;  %v799_v30 = vld [vmem:[%s1019_s3 + $0xa8] ss:$12 sps:$4 sm:$0xff]   ;;  %s724_s29 = smul.u32 3, %s1035_s18 }
  0x12   : > { %s246_s26 = sadd.s32 %s660_s25, %s1035_s18  ;;  %v797_v29 = vld [vmem:[%s1019_s3 + $0xac] ss:$12 sps:$4 sm:$0xff]   ;;  %v800_v31 = vld [vmem:[%s1019_s3 + $0xb0] ss:$12 sps:$4 sm:$0xff]   ;;  %v663_v36 = vld [vmem:[%s1017_s1] ss:$0 sm:$0xff] }
  0x13   : > { %s661_s27 = sshll.u32 %s246_s26, 2  ;;  %472 = vmatpush1.bf16.msra.mxu0 %v779_v14  ;;  %v664_v38 = vld [vmem:[%s1018_s2] ss:$0 sm:$0xff]  ;;  %v326_v44 = vsub.s32 0, %v325_v43  ;;  %v334_v45 = vsub.s32 2, %v325_v43  ;;  %v330_v47 = vsub.s32 1, %v325_v43 }
  0x14   : > { %s248_s30 = scalar_lea.vmem %s1016_s0, %s661_s27  ;;  %709 = vmatpush3.bf16.msra.mxu1 %v780_v15  ;;  %473 = vmatprep.subr.bf16.mxu0 %v781_v16  ;;  %v322_v46 = vld [vmem:[%s1020_s4] sm:$0x7] }
  0x15   : > { %v259_v0 = vld [vmem:[%s248_s30] sm:$0xf]  ;;  %710 = vmatprep.subr.bf16.mxu1 %v843_v4  ;;  %s725_s30 = smul.u32 6, %s1033_s19  ;;  %v327_v48 = vrot.slane %v322_v46, %v326_v44  ;;  %v335_v49 = vrot.slane %v322_v46, %v334_v45  ;;  %v331_v50 = vrot.slane %v322_v46, %v330_v47 }
  0x16   : > { %v260_v1 = vunpack.c.l.bf16 %v259_v0 }
  0x17   : > { %474 = vmatpush1.bf16.msra.mxu0 %v783_v17  ;;  %s255_s8 = sadd.s32 %s725_s30, %s724_s29 }
  0x18   : > { %263 = vadd.xlane.f32.xlu0 %v260_v1  ;;  %711 = vmatpush3.bf16.msra.mxu1 %v784_v18  ;;  %s662_s9 = sshll.u32 %s255_s8, 2 }
  0x19   : > { %712 = vmatprep.subr.bf16.mxu1 %v843_v4  ;;  %475 = vmatprep.subr.bf16.mxu0 %v785_v19  ;;  %s257_s10 = scalar_lea.vmem %s1021_s5, %s662_s9 }
  0x1b   : > { %476 = vmatpush1.bf16.msra.mxu0 %v787_v20 }
  0x1c   : > { %713 = vmatpush3.bf16.msra.mxu1 %v788_v21  ;;  %477 = vmatprep.subr.bf16.mxu0 %v789_v22 }
  0x1d   : > { %714 = vmatprep.subr.bf16.mxu1 %v843_v4 }
  0x1f   : > { %478 = vmatpush1.bf16.msra.mxu0 %v791_v23 }
  0x20   : > { %715 = vmatpush3.bf16.msra.mxu1 %v792_v24  ;;  %479 = vmatprep.subr.bf16.mxu0 %v793_v25 }
  0x21   : > { %716 = vmatprep.subr.bf16.mxu1 %v843_v4 }
  0x23   : > { %480 = vmatpush1.bf16.msra.mxu0 %v795_v27 }
  0x24   : > { %717 = vmatpush3.bf16.msra.mxu1 %v796_v28  ;;  %481 = vmatprep.subr.bf16.mxu0 %v797_v29 }
  0x25   : > { %718 = vmatprep.subr.bf16.mxu1 %v843_v4 }
  0x27   : > { %482 = vmatpush1.bf16.msra.mxu0 %v799_v30 }
  0x28   : > { %719 = vmatpush3.bf16.msra.mxu1 %v800_v31 }
  0xa5   : > { %v264_v10 = vpop.xlane.xlu0 %263 }
  0xa6   : > { %v266_v11 = vmul.f32 0.0078125, %v264_v10 }
  0xa8   : > { %v267_v12 = vsub.f32 %v260_v1, %v266_v11 }
  0xaa   : > { %v268_v13 = vmul.f32 %v267_v12, %v267_v12 }
  0xac   : > { %269 = vadd.xlane.f32.xlu0 %v268_v13 }
 0x139   : > { %v270_v32 = vpop.xlane.xlu0 %269 }
 0x13a   : > { %v271_v33 = vmul.f32 0.0078125, %v270_v32 }
 0x13c   : > { %v272_v34 = vadd.f32 1e-06, %v271_v33 }
 0x13e   : > { %801 = vrsqrt.f32 %v272_v34 }
 0x148   : > { %v802_v35 = vpop.eup %801 }
 0x149   : > { %v274_v37 = vmul.f32 %v802_v35, %v267_v12 }
 0x14b   : > { %v281_v39 = vmul.f32 %v663_v36, %v274_v37 }
 0x14d   : > { %v288_v40 = vadd.f32 %v664_v38, %v281_v39 }
 0x14f   : > { %v289_v41 = vpack.c.bf16 %v288_v40, %v288_v40 }
 0x151   : > { %500 = vmatmul.mubr.bf16.vlgmr.msra.gmra.mrb[0].mxu0 %v289_v41  ;;  %721 = vmatmul.mubr.bf16.vlgmr.msra.gmra.mrb[0].mxu1 %v289_v41 }
 0x224   : > { %v501_v51 = vpop.f32.mrb[0].mxu0  ;;  %v542_v52 = vpop.f32.mrb[0].mxu1 }
 0x225   : > { %v502_v53 = vadd.f32 %v501_v51, %v327_v48  ;;  %v543_v54 = vadd.f32 %v542_v52, %v335_v49  ;;  %v503_v55 = vpop.f32.mrb[1].mxu0  ;;  %v722_v56 = vpop.f32.mrb[1].mxu1 }
 0x226   : > { %v504_v57 = vadd.f32 %v503_v55, %v331_v50  ;;  %v505_v58 = vpop.f32.mrb[2].mxu0  ;;  %v545_v59 = vpop.f32.mrb[2].mxu1 }
 0x227   : > { %v694_v60 = vpack.c.bf16 %v543_v54, %v543_v54  ;;  %v506_v61 = vpop.f32.mrb[3].mxu0  ;;  %v723_v62 = vpop.f32.mrb[3].mxu1 }
 0x228   : > { %v693_v63 = vpack.c.bf16 %v504_v57, %v502_v53 }
 0x229   : > { %562 = vst [vmem:[%s257_s10 + $0x8] sm:$0xf] %v694_v60 }
 0x22a   : > { %561 = vst [vmem:[%s257_s10] sm:$0xff] %v693_v63 }
 0x22b PF: > { %s15_s22 = sadd.s32 1, %s841_s22   ;;  %s1022_s18 = smov %s833_s20 }
 0x22c   : > { %p12_p7 = scmp.ge.s32.totalorder %s15_s22, 6   ;;  %s1023_s19 = smov %s837_s21 }
 0x22d   : > { %s1024_s20 = smov %s1027_s23  ;;  %s1025_s21 = smov %s1031_s24 }
 0x22e   :  { %14 = sbr.rel (!%p12_p7) target bundleno = 3 (0x3), region = 70 }

// kernel: model_forward.8
= control target key start
LH: loop header
LB: loop body
LE: loop exit
PB: predicated region body
PF: predicated region fallthrough
CT: control target
= control target key end

     0   :  { %s1736_s12 = smov 0   ;;  %s2069_s0 = inlined_call_operand.vmem [shape: bf16[2,16,1536], index: 0, kind: input, shape index: {}]   ;;  %s2070_s1 = inlined_call_operand.vmem [shape: bf16[1536,128], index: 1, kind: input, shape index: {}]   ;;  %s2071_s2 = inlined_call_operand.vmem [shape: f32[16,128], index: 2, kind: input, shape index: {}]   ;;  %s2072_s3 = inlined_call_operand.vmem [shape: bf16[2,16,128], index: 3, kind: output, shape index: {}]  }
   0x1 LB: > { %s1325_s13 = sadd.s32 4294967295, %s1714_s12   ;;  %p1329_p0 = scmp.ge.s32.totalorder %s1714_s12, 1  ;;  %s1714_s12 = sphi %s1736_s12, %s13_s12  }
   0x2   : > { %p137_p1 = scmp.lt.s32.totalorder %s1714_s12, 3 }
   0x4   : > { %p138_p2 = pnand %p1329_p0, %p137_p1 }
   0x5   : > { %v1594_v0 = vld [vmem:[%s2070_s1 + $0x40] sm:$0xff] (!%p138_p2)   ;;  %v1598_v4 = vld [vmem:[%s2070_s1 + $0x48] sm:$0xff] (!%p138_p2)   ;;  %v1602_v8 = vld [vmem:[%s2070_s1 + $0x50] sm:$0xff] (!%p138_p2)   ;;  %p161_p3 = scmp.lt.s32.totalorder (!%p138_p2), %s1325_s13, 1 }
   0x6   : > { %141 = sbr.rel (%p138_p2) target bundleno = 327 (0x147), region = 32  ;;  %v1595_v1 = vld [vmem:[%s2070_s1 + $0xc0] sm:$0xff] (!%p138_p2)   ;;  %1453 = vmatprep.subr.bf16.mxu0 (!%p138_p2), %v1594_v0  ;;  %v1599_v5 = vld [vmem:[%s2070_s1 + $0xc8] sm:$0xff] (!%p138_p2)   ;;  %v1603_v9 = vld [vmem:[%s2070_s1 + $0xd0] sm:$0xff] (!%p138_p2)  }
   0x7   : > { %v1596_v2 = vld [vmem:[%s2070_s1] sm:$0xff] (!%p138_p2)   ;;  %1475 = vmatprep.subr.bf16.mxu1 (!%p138_p2), %v1595_v1  ;;  %v1600_v6 = vld [vmem:[%s2070_s1 + $0x8] sm:$0xff] (!%p138_p2)   ;;  %v1604_v10 = vld [vmem:[%s2070_s1 + $0x10] sm:$0xff] (!%p138_p2)  }
   0x8   : > { %v1597_v3 = vld [vmem:[%s2070_s1 + $0x80] sm:$0xff] (!%p138_p2)   ;;  %1454 = vmatpush3.bf16.msra.mxu0 (!%p138_p2), %v1596_v2  ;;  %v1601_v7 = vld [vmem:[%s2070_s1 + $0x88] sm:$0xff] (!%p138_p2)   ;;  %v1605_v11 = vld [vmem:[%s2070_s1 + $0x90] sm:$0xff] (!%p138_p2)  }
   0x9   : > { %1476 = vmatpush3.bf16.msra.mxu1 (!%p138_p2), %v1597_v3  ;;  %1455 = vmatprep.subr.bf16.mxu0 (!%p138_p2), %v1598_v4  ;;  %v1606_v12 = vld [vmem:[%s2070_s1 + $0x58] sm:$0xff] (!%p138_p2)   ;;  %v1610_v16 = vld [vmem:[%s2070_s1 + $0x60] sm:$0xff] (!%p138_p2)   ;;  %v1614_v20 = vld [vmem:[%s2070_s1 + $0x68] sm:$0xff] (!%p138_p2)  }
   0xa   : > { %1477 = vmatprep.subr.bf16.mxu1 (!%p138_p2), %v1599_v5  ;;  %v1607_v13 = vld [vmem:[%s2070_s1 + $0xd8] sm:$0xff] (!%p138_p2)   ;;  %v1611_v17 = vld [vmem:[%s2070_s1 + $0xe0] sm:$0xff] (!%p138_p2)   ;;  %v1615_v21 = vld [vmem:[%s2070_s1 + $0xe8] sm:$0xff] (!%p138_p2)  }
   0xb   : > { %v1608_v14 = vld [vmem:[%s2070_s1 + $0x18] sm:$0xff] (!%p138_p2)   ;;  %v1612_v18 = vld [vmem:[%s2070_s1 + $0x20] sm:$0xff] (!%p138_p2)   ;;  %v1616_v22 = vld [vmem:[%s2070_s1 + $0x28] sm:$0xff] (!%p138_p2)  }
   0xc   : > { %1456 = vmatpush3.bf16.msra.mxu0 (!%p138_p2), %v1600_v6  ;;  %v1609_v15 = vld [vmem:[%s2070_s1 + $0x98] sm:$0xff] (!%p138_p2)   ;;  %v1613_v19 = vld [vmem:[%s2070_s1 + $0xa0] sm:$0xff] (!%p138_p2)   ;;  %v1617_v23 = vld [vmem:[%s2070_s1 + $0xa8] sm:$0xff] (!%p138_p2)  }
   0xd   : > { %1478 = vmatpush3.bf16.msra.mxu1 %v1601_v7  ;;  %1457 = vmatprep.subr.bf16.mxu0 %v1602_v8  ;;  %s2074_s13 = smov (!%p161_p3, %s1325_s13), 1  ;;  %v1618_v24 = vld [vmem:[%s2070_s1 + $0x70] sm:$0xff]   ;;  %v1622_v28 = vld [vmem:[%s2070_s1 + $0x78] sm:$0xff]   ;;  %v1632_v36 = vld [vmem:[%s2070_s1 + $0x140] sm:$0xff]  }
   0xe   : > { %1479 = vmatprep.subr.bf16.mxu1 %v1603_v9  ;;  %v1619_v25 = vld [vmem:[%s2070_s1 + $0xf0] sm:$0xff]   ;;  %s1585_s16 = smul.u32 96, %s2074_s13  ;;  %v1623_v29 = vld [vmem:[%s2070_s1 + $0xf8] sm:$0xff]   ;;  %v1633_v37 = vld [vmem:[%s2070_s1 + $0x1c0] sm:$0xff]  }
   0xf   : > { %v1620_v26 = vld [vmem:[%s2070_s1 + $0x30] sm:$0xff]   ;;  %v1624_v30 = vld [vmem:[%s2070_s1 + $0x38] sm:$0xff]   ;;  %v1634_v38 = vld [vmem:[%s2070_s1 + $0x100] sm:$0xff]  }
  0x10   : > { %1458 = vmatpush3.bf16.msra.mxu0 %v1604_v10  ;;  %v1621_v27 = vld [vmem:[%s2070_s1 + $0xb0] sm:$0xff]   ;;  %s1844_s27 = scalar_lea.vmem %s2069_s0, %s1585_s16  ;;  %v1625_v31 = vld [vmem:[%s2070_s1 + $0xb8] sm:$0xff]   ;;  %v1635_v39 = vld [vmem:[%s2070_s1 + $0x180] sm:$0xff]  }
  0x11   : > { %1480 = vmatpush3.bf16.msra.mxu1 %v1605_v11  ;;  %1459 = vmatprep.subr.bf16.mxu0 %v1606_v12  ;;  %v1626_v32 = vld [vmem:[%s1844_s27] ss:$48 sps:$4 sm:$0xff]   ;;  %v1628_v33 = vld [vmem:[%s1844_s27 + $0x4] ss:$48 sps:$4 sm:$0xff]   ;;  %v1629_v34 = vld [vmem:[%s1844_s27 + $0x8] ss:$48 sps:$4 sm:$0xff]  }
  0x12   : > { %1481 = vmatprep.subr.bf16.mxu1 %v1607_v13  ;;  %v1631_v35 = vld [vmem:[%s1844_s27 + $0xc] ss:$48 sps:$4 sm:$0xff]   ;;  %1046 = vmatprep.mubr.bf16.mxu0 %v1628_v33  ;;  %v1640_v44 = vld [vmem:[%s2070_s1 + $0x150] sm:$0xff]   ;;  %v1648_v52 = vld [vmem:[%s2070_s1 + $0x160] sm:$0xff]  }
  0x13   : > { %1087 = vmatprep.mubr.bf16.mxu1 %v1631_v35  ;;  %v1636_v40 = vld [vmem:[%s2070_s1 + $0x148] sm:$0xff]   ;;  %v1641_v45 = vld [vmem:[%s2070_s1 + $0x1d0] sm:$0xff]   ;;  %v1644_v48 = vld [vmem:[%s2070_s1 + $0x158] sm:$0xff]  }
  0x14   : > { %1460 = vmatpush3.bf16.msra.mxu0 %v1608_v14  ;;  %v1637_v41 = vld [vmem:[%s2070_s1 + $0x1c8] sm:$0xff]   ;;  %v1642_v46 = vld [vmem:[%s2070_s1 + $0x110] sm:$0xff]   ;;  %v1645_v49 = vld [vmem:[%s2070_s1 + $0x1d8] sm:$0xff]  }
  0x15   : > { %1482 = vmatpush3.bf16.msra.mxu1 %v1609_v15  ;;  %1461 = vmatprep.subr.bf16.mxu0 %v1610_v16  ;;  %v1638_v42 = vld [vmem:[%s2070_s1 + $0x108] sm:$0xff]   ;;  %v1643_v47 = vld [vmem:[%s2070_s1 + $0x190] sm:$0xff]   ;;  %v1646_v50 = vld [vmem:[%s2070_s1 + $0x118] sm:$0xff]  }
  0x16   : > { %1483 = vmatprep.subr.bf16.mxu1 %v1611_v17  ;;  %v1639_v43 = vld [vmem:[%s2070_s1 + $0x188] sm:$0xff]   ;;  %v1647_v51 = vld [vmem:[%s2070_s1 + $0x198] sm:$0xff]   ;;  %v1649_v53 = vld [vmem:[%s2070_s1 + $0x1e0] sm:$0xff]  }
  0x17   : > { %v1650_v54 = vld [vmem:[%s2070_s1 + $0x120] sm:$0xff]   ;;  %v1652_v56 = vld [vmem:[%s2070_s1 + $0x168] sm:$0xff]   ;;  %v1656_v60 = vld [vmem:[%s2070_s1 + $0x170] sm:$0xff]  }
  0x18   : > { %1462 = vmatpush3.bf16.msra.mxu0 %v1612_v18  ;;  %v1651_v55 = vld [vmem:[%s2070_s1 + $0x1a0] sm:$0xff]   ;;  %v1653_v57 = vld [vmem:[%s2070_s1 + $0x1e8] sm:$0xff]   ;;  %v1657_v61 = vld [vmem:[%s2070_s1 + $0x1f0] sm:$0xff]  }
  0x19   : > { %1484 = vmatpush3.bf16.msra.mxu1 %v1613_v19  ;;  %1463 = vmatprep.subr.bf16.mxu0 %v1614_v20  ;;  %v1654_v58 = vld [vmem:[%s2070_s1 + $0x128] sm:$0xff]   ;;  %v1658_v62 = vld [vmem:[%s2070_s1 + $0x130] sm:$0xff]   ;;  %v1660_v0 = vld [vmem:[%s2070_s1 + $0x178] sm:$0xff]  }
  0x1a   : > { %1485 = vmatprep.subr.bf16.mxu1 %v1615_v21  ;;  %v1655_v59 = vld [vmem:[%s2070_s1 + $0x1a8] sm:$0xff]   ;;  %v1659_v63 = vld [vmem:[%s2070_s1 + $0x1b0] sm:$0xff]   ;;  %v1661_v1 = vld [vmem:[%s2070_s1 + $0x1f8] sm:$0xff]  }
  0x1b   : > { %v1662_v2 = vld [vmem:[%s2070_s1 + $0x138] sm:$0xff]   ;;  %v1664_v4 = vld [vmem:[%s1844_s27 + $0x10] ss:$48 sps:$4 sm:$0xff]   ;;  %v1666_v5 = vld [vmem:[%s1844_s27 + $0x14] ss:$48 sps:$4 sm:$0xff]  }
  0x1c   : > { %1464 = vmatpush3.bf16.msra.mxu0 %v1616_v22  ;;  %v1663_v3 = vld [vmem:[%s2070_s1 + $0x1b8] sm:$0xff]   ;;  %v1670_v8 = vld [vmem:[%s2070_s1 + $0x240] sm:$0xff]   ;;  %v1674_v12 = vld [vmem:[%s2070_s1 + $0x248] sm:$0xff]  }
  0x1d   : > { %1486 = vmatpush3.bf16.msra.mxu1 %v1617_v23  ;;  %1465 = vmatprep.subr.bf16.mxu0 %v1618_v24  ;;  %v1667_v6 = vld [vmem:[%s1844_s27 + $0x18] ss:$48 sps:$4 sm:$0xff]   ;;  %v1669_v7 = vld [vmem:[%s1844_s27 + $0x1c] ss:$48 sps:$4 sm:$0xff]   ;;  %v1671_v9 = vld [vmem:[%s2070_s1 + $0x2c0] sm:$0xff]  }
  0x1e   : > { %1487 = vmatprep.subr.bf16.mxu1 %v1619_v25  ;;  %v1672_v10 = vld [vmem:[%s2070_s1 + $0x200] sm:$0xff]   ;;  %v1675_v13 = vld [vmem:[%s2070_s1 + $0x2c8] sm:$0xff]   ;;  %v1678_v16 = vld [vmem:[%s2070_s1 + $0x250] sm:$0xff]  }
  0x1f   : > { %v1673_v11 = vld [vmem:[%s2070_s1 + $0x280] sm:$0xff]   ;;  %v1676_v14 = vld [vmem:[%s2070_s1 + $0x208] sm:$0xff]   ;;  %v1679_v17 = vld [vmem:[%s2070_s1 + $0x2d0] sm:$0xff]  }
  0x20   : > { %1466 = vmatpush3.bf16.msra.mxu0 %v1620_v26  ;;  %v1677_v15 = vld [vmem:[%s2070_s1 + $0x288] sm:$0xff]   ;;  %v1680_v18 = vld [vmem:[%s2070_s1 + $0x210] sm:$0xff]   ;;  %v1682_v20 = vld [vmem:[%s2070_s1 + $0x258] sm:$0xff]  }
  0x21   : > { %1488 = vmatpush3.bf16.msra.mxu1 %v1621_v27  ;;  %1467 = vmatprep.subr.bf16.mxu0 %v1622_v28  ;;  %v1681_v19 = vld [vmem:[%s2070_s1 + $0x290] sm:$0xff]   ;;  %v1683_v21 = vld [vmem:[%s2070_s1 + $0x2d8] sm:$0xff]   ;;  %v1686_v24 = vld [vmem:[%s2070_s1 + $0x260] sm:$0xff]  }
  0x22   : > { %1489 = vmatprep.subr.bf16.mxu1 %v1623_v29  ;;  %v1684_v22 = vld [vmem:[%s2070_s1 + $0x218] sm:$0xff]   ;;  %v1687_v25 = vld [vmem:[%s2070_s1 + $0x2e0] sm:$0xff]   ;;  %v1690_v28 = vld [vmem:[%s2070_s1 + $0x268] sm:$0xff]  }
  0x23   : > { %v1685_v23 = vld [vmem:[%s2070_s1 + $0x298] sm:$0xff]   ;;  %v1688_v26 = vld [vmem:[%s2070_s1 + $0x220] sm:$0xff]   ;;  %v1691_v29 = vld [vmem:[%s2070_s1 + $0x2e8] sm:$0xff]  }
  0x24   : > { %1468 = vmatpush3.bf16.msra.mxu0 %v1624_v30  ;;  %v1689_v27 = vld [vmem:[%s2070_s1 + $0x2a0] sm:$0xff]   ;;  %v1692_v30 = vld [vmem:[%s2070_s1 + $0x228] sm:$0xff]   ;;  %v1695_v33 = vld [vmem:[%s2070_s1 + $0x2f0] sm:$0xff]  }
  0x25   : > { %1490 = vmatpush3.bf16.msra.mxu1 %v1625_v31  ;;  %1497 = vmatprep.subr.bf16.mxu0 %v1632_v36  ;;  %v1693_v31 = vld [vmem:[%s2070_s1 + $0x2a8] sm:$0xff]   ;;  %v1697_v35 = vld [vmem:[%s2070_s1 + $0x2b0] sm:$0xff]   ;;  %v1698_v36 = vld [vmem:[%s2070_s1 + $0x278] sm:$0xff]  }
  0x26   : > { %1519 = vmatprep.subr.bf16.mxu1 %v1633_v37  ;;  %v1699_v37 = vld [vmem:[%s2070_s1 + $0x2f8] sm:$0xff]  }
  0x27   : > { %1047 = vmatmul.mubr.bf16.vlgmr.msra.gmra.mrb[0].mxu0 %v1626_v32  ;;  %v1694_v32 = vld [vmem:[%s2070_s1 + $0x270] sm:$0xff]  }
  0x28   : > { %1088 = vmatmul.mubr.bf16.vlgmr.msra.gmra.mrb[0].mxu1 %v1629_v34  ;;  %1498 = vmatpush3.bf16.msra.mxu0 %v1634_v38  ;;  %v1696_v34 = vld [vmem:[%s2070_s1 + $0x230] sm:$0xff]   ;;  %v1700_v38 = vld [vmem:[%s2070_s1 + $0x238] sm:$0xff]  }
  0x29   : > { %1520 = vmatpush3.bf16.msra.mxu1 %v1635_v39  ;;  %1499 = vmatprep.subr.bf16.mxu0 %v1636_v40  ;;  %v1701_v39 = vld [vmem:[%s2070_s1 + $0x2b8] sm:$0xff]   ;;  %v1702_v40 = vld [vmem:[%s1844_s27 + $0x20] ss:$48 sps:$4 sm:$0xff]  }
  0x2a   : > { %1521 = vmatprep.subr.bf16.mxu1 %v1637_v41  ;;  %1128 = vmatprep.mubr.bf16.mxu0 %v1666_v5  ;;  %v1704_v41 = vld [vmem:[%s1844_s27 + $0x24] ss:$48 sps:$4 sm:$0xff]  }
  0x2b   : > { %1169 = vmatprep.mubr.bf16.mxu1 %v1669_v7 }
  0x2c   : > { %1500 = vmatpush3.bf16.msra.mxu0 %v1638_v42  ;;  %v1705_v42 = vld [vmem:[%s1844_s27 + $0x28] ss:$48 sps:$4 sm:$0xff]  }
  0x2d   : > { %1522 = vmatpush3.bf16.msra.mxu1 %v1639_v43  ;;  %1501 = vmatprep.subr.bf16.mxu0 %v1640_v44  ;;  %v1707_v43 = vld [vmem:[%s1844_s27 + $0x2c] ss:$48 sps:$4 sm:$0xff]   ;;  %s1445_s27 = sshll.u32 %s2074_s13, 3 }
  0x2e   : > { %1523 = vmatprep.subr.bf16.mxu1 %v1641_v45  ;;  %s170_s21 = scalar_lea.vmem %s2072_s3, %s1445_s27 }
  0x30   : > { %1502 = vmatpush3.bf16.msra.mxu0 %v1642_v46  ;;  %v376_v46 = vld [vmem:[%s2071_s2] sm:$0xff] }
  0x31   : > { %1524 = vmatpush3.bf16.msra.mxu1 %v1643_v47  ;;  %1503 = vmatprep.subr.bf16.mxu0 %v1644_v48 }
  0x32   : > { %1525 = vmatprep.subr.bf16.mxu1 %v1645_v49 }
  0x34   : > { %1504 = vmatpush3.bf16.msra.mxu0 %v1646_v50 }
  0x35   : > { %1526 = vmatpush3.bf16.msra.mxu1 %v1647_v51  ;;  %1505 = vmatprep.subr.bf16.mxu0 %v1648_v52 }
  0x36   : > { %1527 = vmatprep.subr.bf16.mxu1 %v1649_v53  ;;  %v377_v53 = vld [vmem:[%s2071_s2 + $0x8] sm:$0xff] }
  0x38   : > { %1506 = vmatpush3.bf16.msra.mxu0 %v1650_v54 }
  0x39   : > { %1528 = vmatpush3.bf16.msra.mxu1 %v1651_v55  ;;  %1507 = vmatprep.subr.bf16.mxu0 %v1652_v56 }
  0x3a   : > { %1529 = vmatprep.subr.bf16.mxu1 %v1653_v57 }
  0x3c   : > { %1508 = vmatpush3.bf16.msra.mxu0 %v1654_v58 }
  0x3d   : > { %1530 = vmatpush3.bf16.msra.mxu1 %v1655_v59  ;;  %1509 = vmatprep.subr.bf16.mxu0 %v1656_v60 }
  0x3e   : > { %1531 = vmatprep.subr.bf16.mxu1 %v1657_v61 }
  0x40   : > { %1510 = vmatpush3.bf16.msra.mxu0 %v1658_v62 }
  0x41   : > { %1532 = vmatpush3.bf16.msra.mxu1 %v1659_v63  ;;  %1511 = vmatprep.subr.bf16.mxu0 %v1660_v0 }
  0x42   : > { %1533 = vmatprep.subr.bf16.mxu1 %v1661_v1 }
  0x44   : > { %1512 = vmatpush3.bf16.msra.mxu0 %v1662_v2 }
  0x45   : > { %1534 = vmatpush3.bf16.msra.mxu1 %v1663_v3  ;;  %1541 = vmatprep.subr.bf16.mxu0 %v1670_v8 }
  0x46   : > { %1563 = vmatprep.subr.bf16.mxu1 %v1671_v9 }
  0x47   : > { %1129 = vmatmul.mubr.bf16.vlgmr.msra.gmra.mrb[4].mxu0 %v1664_v4 }
  0x48   : > { %1170 = vmatmul.mubr.bf16.vlgmr.msra.gmra.mrb[4].mxu1 %v1667_v6  ;;  %1542 = vmatpush3.bf16.msra.mxu0 %v1672_v10 }
  0x49   : > { %1564 = vmatpush3.bf16.msra.mxu1 %v1673_v11  ;;  %1543 = vmatprep.subr.bf16.mxu0 %v1674_v12 }
  0x4a   : > { %1565 = vmatprep.subr.bf16.mxu1 %v1675_v13  ;;  %1210 = vmatprep.mubr.bf16.mxu0 %v1704_v41 }
  0x4b   : > { %1251 = vmatprep.mubr.bf16.mxu1 %v1707_v43 }
  0x4c   : > { %1544 = vmatpush3.bf16.msra.mxu0 %v1676_v14 }
  0x4d   : > { %1566 = vmatpush3.bf16.msra.mxu1 %v1677_v15  ;;  %1545 = vmatprep.subr.bf16.mxu0 %v1678_v16 }
  0x4e   : > { %1567 = vmatprep.subr.bf16.mxu1 %v1679_v17 }
  0x50   : > { %1546 = vmatpush3.bf16.msra.mxu0 %v1680_v18 }
  0x51   : > { %1568 = vmatpush3.bf16.msra.mxu1 %v1681_v19  ;;  %1547 = vmatprep.subr.bf16.mxu0 %v1682_v20 }
  0x52   : > { %1569 = vmatprep.subr.bf16.mxu1 %v1683_v21 }
  0x54   : > { %1548 = vmatpush3.bf16.msra.mxu0 %v1684_v22 }
  0x55   : > { %1570 = vmatpush3.bf16.msra.mxu1 %v1685_v23  ;;  %1549 = vmatprep.subr.bf16.mxu0 %v1686_v24 }
  0x56   : > { %1571 = vmatprep.subr.bf16.mxu1 %v1687_v25 }
  0x58   : > { %1550 = vmatpush3.bf16.msra.mxu0 %v1688_v26 }
  0x59   : > { %1572 = vmatpush3.bf16.msra.mxu1 %v1689_v27  ;;  %1551 = vmatprep.subr.bf16.mxu0 %v1690_v28 }
  0x5a   : > { %1573 = vmatprep.subr.bf16.mxu1 %v1691_v29 }
  0x5c   : > { %1552 = vmatpush3.bf16.msra.mxu0 %v1692_v30 }
  0x5d   : > { %1574 = vmatpush3.bf16.msra.mxu1 %v1693_v31  ;;  %1553 = vmatprep.subr.bf16.mxu0 %v1694_v32 }
  0x5e   : > { %1575 = vmatprep.subr.bf16.mxu1 %v1695_v33 }
  0x60   : > { %1554 = vmatpush3.bf16.msra.mxu0 %v1696_v34 }
  0x61   : > { %1576 = vmatpush3.bf16.msra.mxu1 %v1697_v35  ;;  %1555 = vmatprep.subr.bf16.mxu0 %v1698_v36 }
  0x62   : > { %1577 = vmatprep.subr.bf16.mxu1 %v1699_v37 }
  0x64   : > { %1556 = vmatpush3.bf16.msra.mxu0 %v1700_v38 }
  0x65   : > { %1578 = vmatpush3.bf16.msra.mxu1 %v1701_v39 }
  0x67   : > { %1211 = vmatmul.mubr.bf16.vlgmr.msra.gmra.mrb[8].mxu0 %v1702_v40 }
  0x68   : > { %1252 = vmatmul.mubr.bf16.vlgmr.msra.gmra.mrb[8].mxu1 %v1705_v42 }
  0xfa   : > { %v1469_v44 = vpop.f32.mrb[0].mxu0 }
  0xfb   : > { %v1491_v45 = vpop.f32.mrb[0].mxu1  ;;  %v1470_v47 = vpop.f32.mrb[1].mxu0 }
  0xfc   : > { %v1471_v48 = vadd.f32 %v1470_v47, %v1469_v44  ;;  %v1492_v49 = vpop.f32.mrb[1].mxu1  ;;  %v1472_v50 = vpop.f32.mrb[2].mxu0 }
  0xfd   : > { %v1493_v51 = vadd.f32 %v1492_v49, %v1491_v45  ;;  %v1494_v52 = vpop.f32.mrb[2].mxu1  ;;  %v1473_v54 = vpop.f32.mrb[3].mxu0 }
  0xfe   : > { %v1049_v55 = vadd.f32 %v1471_v48, %v376_v46  ;;  %v1474_v56 = vadd.f32 %v1473_v54, %v1472_v50  ;;  %v1495_v57 = vpop.f32.mrb[3].mxu1 }
  0xff   : > { %v1496_v58 = vadd.f32 %v1495_v57, %v1494_v52 }
 0x100   : > { %v1090_v59 = vadd.f32 %v1493_v51, %v1049_v55  ;;  %v1052_v60 = vadd.f32 %v1474_v56, %v377_v53 }
 0x102   : > { %v1093_v61 = vadd.f32 %v1496_v58, %v1052_v60 }
 0x11a   : > { %v1513_v62 = vpop.f32.mrb[4].mxu0 }
 0x11b   : > { %v1514_v63 = vpop.f32.mrb[5].mxu0  ;;  %v1535_v0 = vpop.f32.mrb[4].mxu1 }
 0x11c   : > { %v1515_v1 = vadd.f32 %v1514_v63, %v1513_v62  ;;  %v1516_v2 = vpop.f32.mrb[6].mxu0  ;;  %v1536_v3 = vpop.f32.mrb[5].mxu1 }
 0x11d   : > { %v1517_v4 = vpop.f32.mrb[7].mxu0  ;;  %v1537_v6 = vadd.f32 %v1536_v3, %v1535_v0  ;;  %v1538_v7 = vpop.f32.mrb[6].mxu1 }
 0x11e   : > { %v1131_v5 = vadd.f32 %v1515_v1, %v1090_v59  ;;  %v1518_v8 = vadd.f32 %v1517_v4, %v1516_v2  ;;  %v1539_v9 = vpop.f32.mrb[7].mxu1 }
 0x11f   : > { %v1540_v12 = vadd.f32 %v1539_v9, %v1538_v7 }
 0x120   : > { %v1172_v10 = vadd.f32 %v1537_v6, %v1131_v5  ;;  %v1134_v11 = vadd.f32 %v1518_v8, %v1093_v61 }
 0x122   : > { %v1175_v13 = vadd.f32 %v1540_v12, %v1134_v11 }
 0x13a   : > { %v1557_v14 = vpop.f32.mrb[8].mxu0 }
 0x13b   : > { %v1579_v15 = vpop.f32.mrb[8].mxu1  ;;  %v1558_v16 = vpop.f32.mrb[9].mxu0 }
 0x13c   : > { %v1559_v17 = vadd.f32 %v1558_v16, %v1557_v14  ;;  %v1580_v18 = vpop.f32.mrb[9].mxu1  ;;  %v1560_v19 = vpop.f32.mrb[10].mxu0 }
 0x13d   : > { %v1581_v20 = vadd.f32 %v1580_v18, %v1579_v15  ;;  %v1582_v21 = vpop.f32.mrb[10].mxu1  ;;  %v1561_v22 = vpop.f32.mrb[11].mxu0 }
 0x13e   : > { %v1213_v23 = vadd.f32 %v1559_v17, %v1172_v10  ;;  %v1562_v24 = vadd.f32 %v1561_v22, %v1560_v19  ;;  %v1583_v25 = vpop.f32.mrb[11].mxu1 }
 0x13f   : > { %v1584_v26 = vadd.f32 %v1583_v25, %v1582_v21 }
 0x140   : > { %v1254_v27 = vadd.f32 %v1581_v20, %v1213_v23  ;;  %v1216_v28 = vadd.f32 %v1562_v24, %v1175_v13 }
 0x142   : > { %v1257_v29 = vadd.f32 %v1584_v26, %v1216_v28 }
 0x144   : > { %v1451_v30 = vpack.c.bf16 %v1257_v29, %v1254_v27 }
 0x146   : > { %1452 = vst [vmem:[%s170_s21] sm:$0xff] %v1451_v30  }
 0x147 PF: > { %s13_s12 = sadd.s32 1, %s1714_s12  }
 0x148   : > { %p10_p4 = scmp.ge.s32.totalorder %s13_s12, 4  }
 0x14a   :  { %12 = sbr.rel (!%p10_p4) target bundleno = 1 (0x1), region = 62 }

// kernel: model_forward.10
= control target key start
LH: loop header
LB: loop body
LE: loop exit
PB: predicated region body
PF: predicated region fallthrough
CT: control target
= control target key end

     0   :  { %s1186_s12 = smov 0   ;;  %s1188_s13 = smov 0   ;;  %s1352_s0 = inlined_call_operand.vmem [shape: bf16[2,4,16,32], index: 0, kind: input, shape index: {}]   ;;  %s1353_s1 = inlined_call_operand.vmem [shape: bf16[2,4,16,32], index: 1, kind: input, shape index: {}]   ;;  %s1354_s2 = inlined_call_operand.vmem [shape: bf16[2,4,16,32], index: 2, kind: input, shape index: {}]   ;;  %s1355_s3 = inlined_call_operand.vmem [shape: bf16[2,4,16,32], index: 3, kind: output, shape index: {}]  }
   0x1   :  { %s1190_s14 = smov 0   ;;  %s1192_s15 = smov 0  }
   0x2   :  { %s1194_s16 = smov 0   ;;  %s1196_s17 = smov 0  }
   0x3   :  { %s1198_s18 = smov 0  }
   0x4 LB: > { %s22_s19 = sadd.s32 1, %s1154_s16  ;;  %s25_s20 = sadd.s32 1, %s1158_s17  ;;  %s1162_s18 = sphi %s1198_s18, %s13_s18   ;;  %s1158_s17 = sphi %s1196_s17, %s1362_s17   ;;  %s1154_s16 = sphi %s1194_s16, %s1361_s16   ;;  %s1150_s15 = sphi %s1192_s15, %s1360_s15   ;;  %s1146_s14 = sphi %s1190_s14, %s1359_s14   ;;  %s1142_s13 = sphi %s1188_s13, %s1358_s13   ;;  %s1138_s12 = sphi %s1186_s12, %s1357_s12  }
   0x5   : > { %p23_p0 = scmp.ge.s32.totalorder %s22_s19, 2  ;;  %s925_s21 = sadd.s32 4294967295, %s1162_s18  }
   0x6   : > { %p41_p1 = scmp.ne.s32.totalorder %s1142_s13, %s1138_s12  ;;  %p42_p2 = scmp.eq.s32.totalorder %s1162_s18, 0 }
   0x7   : > { %s1364_s19 = smov (%p23_p0, %s22_s19), 0  ;;  %s1366_s20 = smov (!%p23_p0, %s25_s20), %s1158_s17 }
   0x8   : > { %p27_p3 = scmp.ge.s32.totalorder %s1366_s20, 2  ;;  %p125_p4 = scmp.eq.s32.totalorder %s925_s21, 3 }
   0x9   : > { %s30_s22 = ssub.s32 %s1154_s16, %s1364_s19  ;;  %p43_p5 = por %p42_p2, %p41_p1 }
   0xa   : > { %s1368_s20 = smov (%p27_p3, %s1366_s20), 0  ;;  %p1234_p6 = por %p125_p4, %p41_p1 }
   0xb   : > { %s29_s24 = ssub.s32 %s1158_s17, %s1368_s20  ;;  %s34_s26 = sadd.s32 1, %s1142_s13 }
   0xc   : > { %s31_s25 = sor.u32 %s30_s22, %s29_s24  ;;  %p928_p8 = scmp.ge.s32.totalorder %s1162_s18, 4 }
   0xd   : > { %p32_p7 = scmp.eq.s32.totalorder %s31_s25, 0 }
   0xe   : > { %147 = sbr.rel (%p928_p8) target bundleno = 29 (0x1d), region = 16 }
   0xf   : > { %s1242_s27 = scalar_select %p32_p7, %s1142_s13, %s34_s26  }
  0x15   : > { %150 = sbr.rel (!%p43_p5) target bundleno = 29 (0x1d), region = 20  ;;  %s152_s28 = sand.u32 (%p43_p5), 1, %s1142_s13  }
  0x16   : > { %s930_s29 = sshll.u32 (%p43_p5), %s1158_s17, 3  ;;  %s929_s30 = sshll.u32 (%p43_p5), %s152_s28, 4 }
  0x17   : > { %s156_s4 = sadd.s32 (%p43_p5), %s1154_s16, %s930_s29  ;;  %s154_s9 = scalar_lea.vmem (%p43_p5), [#allocation2], %s929_s30 }
  0x18   : > { %s931_s5 = sshll.u32 (%p43_p5), %s156_s4, 2 }
  0x19   : > { %s158_s8 = scalar_lea.vmem (%p43_p5), %s1352_s0, %s931_s5 }
  0x1a   : > { %v174_v0 = vld [vmem:[%s158_s8] sm:$0xf] (%p43_p5)  ;;  %v176_v1 = vld [vmem:[%s158_s8 + $0x8] sm:$0xf] (%p43_p5)  ;;  %v178_v2 = vld [vmem:[%s158_s8 + $0x10] sm:$0xf] (%p43_p5) }
  0x1b   : > { %175 = vst [vmem:[%s154_s9] sm:$0xf] (%p43_p5), %v174_v0  ;;  %177 = vst [vmem:[%s154_s9 + $0x4] sm:$0xf] (%p43_p5), %v176_v1  ;;  %v180_v3 = vld [vmem:[%s158_s8 + $0x18] sm:$0xf] (%p43_p5) }
  0x1c   : > { %179 = vst [vmem:[%s154_s9 + $0x8] sm:$0xf] %v178_v2  ;;  %181 = vst [vmem:[%s154_s9 + $0xc] sm:$0xf] %v180_v3 }
  0x1d PF: > { %p932_p9 = scmp.ge.s32.totalorder %s1162_s18, 1  ;;  %p227_p10 = scmp.lt.s32.totalorder %s1162_s18, 5 }
  0x1f   : > { %p228_p11 = pnand %p932_p9, %p227_p10 }
  0x20   : > { %p266_p12 = scmp.lt.s32.totalorder (!%p228_p11), %s1150_s15, 1  ;;  %v1164_v4 = vmov (!%p228_p11), 0.0   ;;  %vm1165_vm0 = vmmov (!%p228_p11), 0   ;;  %s234_s21 = sand.u32 (!%p228_p11), 1, %s1138_s12   ;;  %vm302_vm1 = vcmask (!%p228_p11), 261120   ;;  %v506_v17 = vlaneseq (!%p228_p11) }
  0x21   : > { %231 = sbr.rel (%p228_p11) target bundleno = 819 (0x333), region = 69  ;;  %978 = vmatprep.subr.bf16.mxu0 (!%p228_p11), %v1164_v4  ;;  %984 = vmatprep.subr.bf16.mxu1 (!%p228_p11), %v1164_v4  ;;  %s1265_s26 = sshll.u32 (!%p228_p11), %s234_s21, 4  ;;  %vm513_vm3 = vcmask (!%p228_p11), 130048   ;;  %vm762_vm4 = vcmask (!%p228_p11), 257024  }
  0x22   : > { %980 = vmatprep.mubr.msk.bf16.mxu0 (!%p228_p11), %vm1165_vm0, %v1164_v4  ;;  %986 = vmatprep.mubr.msk.bf16.mxu1 (!%p228_p11), %vm1165_vm0, %v1164_v4  ;;  %s236_s12 = scalar_lea.vmem (!%p228_p11), [#allocation2], %s1265_s26  ;;  %v507_v18 = vand.u32 (!%p228_p11), 127, %v506_v17  ;;  %s265_s4 = scalar_lea.vmem (!%p228_p11), [#allocation3], %s1265_s26 }
  0x23   : > { %v277_v11 = vld [vmem:[%s236_s12] sm:$0xf] (!%p228_p11)  ;;  %v278_v13 = vld [vmem:[%s236_s12 + $0x4] sm:$0xf] (!%p228_p11)  ;;  %v279_v15 = vld [vmem:[%s236_s12 + $0x8] sm:$0xf] (!%p228_p11) }
  0x24   : > { %v280_v16 = vld [vmem:[%s236_s12 + $0xc] sm:$0xf] (!%p228_p11)  ;;  %vm508_vm2 = vcmp.lt.s32.totalorder (!%p228_p11), %v507_v18, 9 }
  0x28   : > { %s267_s10 = scalar_select %p266_p12, %s1150_s15, 1 }
  0x29   : > { %s956_s5 = sshll.u32 (%p1234_p6), %s1150_s15, 3 }
  0x2a   : > { %s960_s11 = sshll.u32 %s267_s10, 5  ;;  %s775_s6 = sadd.s32 (%p1234_p6), %s1146_s14, %s956_s5 }
  0x2b   : > { %s270_s25 = scalar_lea.vmem %s1353_s1, %s960_s11  ;;  %s1271_s30 = scalar_lea.vmem %s1354_s2, %s960_s11 }
  0x2c   : > { %v1084_v5 = vld [vmem:[%s270_s25] sm:$0xff]   ;;  %v1085_v6 = vld [vmem:[%s270_s25 + $0x8] sm:$0xff]   ;;  %v1086_v9 = vld [vmem:[%s270_s25 + $0x10] sm:$0xff]   ;;  %s957_s7 = sshll.u32 (%p1234_p6), %s775_s6, 2 }
  0x2d   : > { %v307_v7 = vsel %vm302_vm1, %v1084_v5, 0  ;;  %v358_v8 = vsel %vm302_vm1, %v1085_v6, 0  ;;  %v1087_v10 = vld [vmem:[%s270_s25 + $0x18] sm:$0xff]   ;;  %v409_v12 = vsel %vm302_vm1, %v1086_v9, 0  ;;  %v1088_v3 = vld [vmem:[%s1271_s30] sm:$0xff]   ;;  %v1089_v5 = vld [vmem:[%s1271_s30 + $0x8] sm:$0xff]   ;;  %s777_s10 = scalar_lea.vmem (%p1234_p6), %s1355_s3, %s957_s7 }
  0x2e   : > { %979 = vmatpush3.bf16.xpose.msra.mxu0 %v307_v7  ;;  %985 = vmatpush3.bf16.xpose.msra.mxu1 %v358_v8  ;;  %v460_v14 = vsel %vm302_vm1, %v1087_v10, 0 }
  0x2f   : > { %990 = vmatprep.subr.bf16.mxu0 %v1164_v4  ;;  %996 = vmatprep.subr.bf16.mxu1 %v1164_v4 }
  0x35   : > { %981 = vmatmul.mubr.msk.bf16.vlgmr.msra.gmra.mrb[0].mxu0 %vm302_vm1, %v277_v11  ;;  %987 = vmatmul.mubr.msk.bf16.vlgmr.msra.gmra.mrb[0].mxu1 %vm302_vm1, %v278_v13 }
  0x36   : > { %991 = vmatpush3.bf16.xpose.msra.mxu0 %v409_v12  ;;  %997 = vmatpush3.bf16.xpose.msra.mxu1 %v460_v14  ;;  %v1090_v12 = vld [vmem:[%s1271_s30 + $0x10] sm:$0xff]  }
  0x37   : > { %992 = vmatprep.mubr.msk.bf16.mxu0 %vm1165_vm0, %v1164_v4  ;;  %998 = vmatprep.mubr.msk.bf16.mxu1 %vm1165_vm0, %v1164_v4 }
  0x38   : > { %1002 = vmatprep.subr.bf16.mxu0 %v1164_v4  ;;  %1008 = vmatprep.subr.bf16.mxu1 %v1164_v4 }
  0x3d   : > { %993 = vmatmul.mubr.msk.bf16.vlgmr.msra.gmra.mrb[4].mxu0 %vm302_vm1, %v279_v15  ;;  %999 = vmatmul.mubr.msk.bf16.vlgmr.msra.gmra.mrb[4].mxu1 %vm302_vm1, %v280_v16  ;;  %v1091_v16 = vld [vmem:[%s1271_s30 + $0x18] sm:$0xff]  }
  0x3e   : > { %1004 = vmatprep.mubr.msk.bf16.mxu0 %vm1165_vm0, %v1164_v4  ;;  %1010 = vmatprep.mubr.msk.bf16.mxu1 %vm1165_vm0, %v1164_v4 }
  0x3f   : > { %1003 = vmatpush3.bf16.msra.mxu0 %v1088_v3  ;;  %1009 = vmatpush3.bf16.msra.mxu1 %v1089_v5 }
  0x40   : > { %1014 = vmatprep.subr.bf16.mxu0 %v1164_v4  ;;  %1020 = vmatprep.subr.bf16.mxu1 %v1164_v4 }
 0x108   : > { %v343_v19 = vpop.f32.mrb[0].mxu0  ;;  %v394_v22 = vpop.f32.mrb[0].mxu1 }
 0x109   : > { %v502_v20 = vmul.f32 0.17677669, %v343_v19  ;;  %v982_v21 = vpop.f32.mrb[1].mxu0  ;;  %v503_v24 = vmul.f32 0.17677669, %v394_v22  ;;  %v988_v25 = vpop.f32.mrb[1].mxu1 }
 0x10a   : > { %v346_v23 = vpop.f32.mrb[2].mxu0  ;;  %v397_v27 = vpop.f32.mrb[2].mxu1 }
 0x10b   : > { %v983_v26 = vpop.f32.mrb[3].mxu0  ;;  %v509_v28 = vsel %vm508_vm2, %v502_v20, -1e+30  ;;  %v989_v29 = vpop.f32.mrb[3].mxu1  ;;  %v510_v31 = vsel %vm508_vm2, %v503_v24, -1e+30 }
 0x10c   : > { %v514_v30 = vsel %vm513_vm3, %v509_v28, -inf  ;;  %v517_v32 = vsel %vm513_vm3, %v510_v31, -inf }
 0x10d   : > { %515 = vmax.xlane.f32.xlu0 %v514_v30 }
 0x110   : > { %v445_v33 = vpop.f32.mrb[4].mxu0  ;;  %v496_v36 = vpop.f32.mrb[4].mxu1 }
 0x111   : > { %v504_v34 = vmul.f32 0.17677669, %v445_v33  ;;  %518 = vmax.xlane.f32.xlu0 %v517_v32  ;;  %v994_v35 = vpop.f32.mrb[5].mxu0  ;;  %v505_v38 = vmul.f32 0.17677669, %v496_v36  ;;  %v1000_v39 = vpop.f32.mrb[5].mxu1 }
 0x112   : > { %v448_v37 = vpop.f32.mrb[6].mxu0  ;;  %v499_v41 = vpop.f32.mrb[6].mxu1 }
 0x113   : > { %v995_v40 = vpop.f32.mrb[7].mxu0  ;;  %v511_v42 = vsel %vm508_vm2, %v504_v34, -1e+30  ;;  %v1001_v43 = vpop.f32.mrb[7].mxu1  ;;  %v512_v45 = vsel %vm508_vm2, %v505_v38, -1e+30 }
 0x114   : > { %v520_v44 = vsel %vm513_vm3, %v511_v42, -inf  ;;  %v523_v46 = vsel %vm513_vm3, %v512_v45, -inf }
 0x115   : > { %521 = vmax.xlane.f32.xlu1 %v520_v44 }
 0x119   : > { %524 = vmax.xlane.f32.xlu1 %v523_v46 }
 0x19a   : > { %v516_v47 = vpop.xlane.xlu0 %515 }
 0x19b   : > { %v526_v48 = vsub.f32 %v509_v28, %v516_v47 }
 0x19d   : > { %v530_v49 = vmul.f32 1.442695, %v526_v48 }
 0x19e   : > { %v519_v50 = vpop.xlane.xlu0 %518 }
 0x19f   : > { %1092 = vpow2.f32 %v530_v49  ;;  %v527_v51 = vsub.f32 %v510_v31, %v519_v50 }
 0x1a1   : > { %v532_v52 = vmul.f32 1.442695, %v527_v51 }
 0x1a2   : > { %v522_v53 = vpop.xlane.xlu1 %521 }
 0x1a3   : > { %1094 = vpow2.f32 %v532_v52  ;;  %v528_v54 = vsub.f32 %v511_v42, %v522_v53 }
 0x1a5   : > { %v534_v55 = vmul.f32 1.442695, %v528_v54 }
 0x1a6   : > { %v525_v56 = vpop.xlane.xlu1 %524 }
 0x1a7   : > { %1096 = vpow2.f32 %v534_v55  ;;  %v529_v57 = vsub.f32 %v512_v45, %v525_v56 }
 0x1a9   : > { %v1093_v58 = vpop.eup %1092  ;;  %v536_v59 = vmul.f32 1.442695, %v529_v57 }
 0x1aa   : > { %v538_v60 = vsel %vm513_vm3, %v1093_v58, 0.0 }
 0x1ab   : > { %1098 = vpow2.f32 %v536_v59  ;;  %539 = vadd.xlane.f32.xlu0 %v538_v60 }
 0x1ad   : > { %v1095_v61 = vpop.eup %1094 }
 0x1ae   : > { %v541_v62 = vsel %vm513_vm3, %v1095_v61, 0.0 }
 0x1af   : > { %542 = vadd.xlane.f32.xlu1 %v541_v62 }
 0x1b1   : > { %v1097_v63 = vpop.eup %1096 }
 0x1b2   : > { %v544_v0 = vsel %vm513_vm3, %v1097_v63, 0.0 }
 0x1b3   : > { %545 = vadd.xlane.f32.xlu0 %v544_v0 }
 0x1b5   : > { %v1099_v1 = vpop.eup %1098 }
 0x1b6   : > { %v547_v2 = vsel %vm513_vm3, %v1099_v1, 0.0 }
 0x1b7   : > { %548 = vadd.xlane.f32.xlu1 %v547_v2 }
 0x238   : > { %v540_v6 = vpop.xlane.xlu0 %539 }
 0x239   : > { %1100 = vrcp.f32 %v540_v6 }
 0x23c   : > { %v543_v7 = vpop.xlane.xlu1 %542 }
 0x23d   : > { %1102 = vrcp.f32 %v543_v7 }
 0x240   : > { %v546_v8 = vpop.xlane.xlu0 %545 }
 0x241   : > { %1104 = vrcp.f32 %v546_v8 }
 0x243   : > { %v1101_v9 = vpop.eup %1100 }
 0x244   : > { %v554_v10 = vmul.f32 %v1101_v9, %v1093_v58  ;;  %v549_v11 = vpop.xlane.xlu1 %548 }
 0x245   : > { %1106 = vrcp.f32 %v549_v11 }
 0x246   : > { %v558_v13 = vpack.c.bf16 %v554_v10, %v554_v10 }
 0x247   : > { %v1103_v14 = vpop.eup %1102 }
 0x248   : > { %v555_v15 = vmul.f32 %v1103_v14, %v1095_v61  ;;  %1005 = vmatmul.mubr.msk.bf16.vlgmr.msra.gmra.mrb[8].mxu0 %vm513_vm3, %v558_v13 }
 0x249   : > { %1015 = vmatpush3.bf16.msra.mxu0 %v1090_v12  ;;  %1016 = vmatprep.mubr.msk.bf16.mxu0 %vm1165_vm0, %v1164_v4 }
 0x24a   : > { %v559_v17 = vpack.c.bf16 %v555_v15, %v555_v15 }
 0x24b   : > { %v1105_v18 = vpop.eup %1104 }
 0x24c   : > { %v556_v19 = vmul.f32 %v1105_v18, %v1097_v63  ;;  %1011 = vmatmul.mubr.msk.bf16.vlgmr.msra.gmra.mrb[8].mxu1 %vm513_vm3, %v559_v17 }
 0x24d   : > { %1021 = vmatpush3.bf16.msra.mxu1 %v1091_v16  ;;  %1022 = vmatprep.mubr.msk.bf16.mxu1 %vm1165_vm0, %v1164_v4 }
 0x24e   : > { %v560_v20 = vpack.c.bf16 %v556_v19, %v556_v19 }
 0x24f   : > { %v1107_v21 = vpop.eup %1106 }
 0x250   : > { %v557_v22 = vmul.f32 %v1107_v21, %v1099_v1  ;;  %1017 = vmatmul.mubr.msk.bf16.vlgmr.msra.gmra.mrb[12].mxu0 %vm513_vm3, %v560_v20 }
 0x252   : > { %v561_v23 = vpack.c.bf16 %v557_v22, %v557_v22 }
 0x254   : > { %1023 = vmatmul.mubr.msk.bf16.vlgmr.msra.gmra.mrb[12].mxu1 %vm513_vm3, %v561_v23 }
 0x31b   : > { %v605_v24 = vpop.f32.mrb[8].mxu0 }
 0x31c   : > { %v758_v25 = vpack.c.bf16 %v605_v24, %v605_v24  ;;  %v1006_v26 = vpop.f32.mrb[9].mxu0 }
 0x31d   : > { %v608_v27 = vpop.f32.mrb[10].mxu0 }
 0x31e   : > { %763 = vst.msk [vmem:[%s265_s4] sm:$0xf] %vm762_vm4, %v758_v25  ;;  %v1007_v28 = vpop.f32.mrb[11].mxu0 }
 0x31f   : > { %v654_v29 = vpop.f32.mrb[8].mxu1 }
 0x320   : > { %v759_v30 = vpack.c.bf16 %v654_v29, %v654_v29  ;;  %v1012_v4 = vpop.f32.mrb[9].mxu1 }
 0x321   : > { %v657_v31 = vpop.f32.mrb[10].mxu1 }
 0x322   : > { %764 = vst.msk [vmem:[%s265_s4 + $0x4] sm:$0xf] %vm762_vm4, %v759_v30  ;;  %v1013_v32 = vpop.f32.mrb[11].mxu1 }
 0x323   : > { %v703_v33 = vpop.f32.mrb[12].mxu0 }
 0x324   : > { %v760_v34 = vpack.c.bf16 %v703_v33, %v703_v33  ;;  %v1018_v35 = vpop.f32.mrb[13].mxu0  ;;  %773 = sbr.rel (!%p1234_p6) target bundleno = 819 (0x333), region = 77 }
 0x325   : > { %v706_v36 = vpop.f32.mrb[14].mxu0  ;;  %v793_v43 = vld [vmem:[%s265_s4] sm:$0xf] (%p1234_p6) }
 0x326   : > { %765 = vst.msk [vmem:[%s265_s4 + $0x8] sm:$0xf] %vm762_vm4, %v760_v34  ;;  %v1019_v37 = vpop.f32.mrb[15].mxu0  ;;  %794 = vst [vmem:[%s777_s10] sm:$0xf] (%p1234_p6), %v793_v43 }
 0x327   : > { %v752_v38 = vpop.f32.mrb[12].mxu1 }
 0x328   : > { %v761_v39 = vpack.c.bf16 %v752_v38, %v752_v38  ;;  %v1024_v40 = vpop.f32.mrb[13].mxu1 }
 0x329   : > { %v755_v41 = vpop.f32.mrb[14].mxu1  ;;  %v795_v44 = vld [vmem:[%s265_s4 + $0x4] sm:$0xf] (%p1234_p6) }
 0x32a   : > { %766 = vst.msk [vmem:[%s265_s4 + $0xc] sm:$0xf] %vm762_vm4, %v761_v39  ;;  %v1025_v42 = vpop.f32.mrb[15].mxu1  ;;  %796 = vst [vmem:[%s777_s10 + $0x8] sm:$0xf] (%p1234_p6), %v795_v44 }
 0x32d   : > { %v797_v45 = vld [vmem:[%s265_s4 + $0x8] sm:$0xf] }
 0x32e   : > { %798 = vst [vmem:[%s777_s10 + $0x10] sm:$0xf] %v797_v45 }
 0x331   : > { %v799_v46 = vld [vmem:[%s265_s4 + $0xc] sm:$0xf] }
 0x332   : > { %800 = vst [vmem:[%s777_s10 + $0x18] sm:$0xf] %v799_v46 }
 0x333 PF: > { %s13_s18 = sadd.s32 1, %s1162_s18   ;;  %s1357_s12 = smov %s1142_s13 }
 0x334   : > { %p10_p13 = scmp.ge.s32.totalorder %s13_s18, 6   ;;  %s1358_s13 = smov %s1242_s27 }
 0x335   : > { %s1359_s14 = smov %s1154_s16  ;;  %s1360_s15 = smov %s1158_s17 }
 0x336   : > { %s1361_s16 = smov %s1364_s19  ;;  %s1362_s17 = smov %s1368_s20 }
 0x337   :  { %12 = sbr.rel (!%p10_p13) target bundleno = 4 (0x4), region = 155 }

// kernel: model_forward.11
= control target key start
LH: loop header
LB: loop body
LE: loop exit
PB: predicated region body
PF: predicated region fallthrough
CT: control target
= control target key end

     0   :  { %s1321_s13 = smov 0   ;;  %s1323_s14 = smov 0   ;;  %s1524_s0 = inlined_call_operand.vmem [shape: bf16[2,16,128], index: 0, kind: input, shape index: {}]   ;;  %s1525_s1 = inlined_call_operand.vmem [shape: bf16[2,16,128], index: 1, kind: input, shape index: {}]   ;;  %s1526_s2 = inlined_call_operand.vmem [shape: bf16[128,128], index: 2, kind: input, shape index: {}]   ;;  %s1527_s3 = inlined_call_operand.vmem [shape: f32[1,128], index: 3, kind: input, shape index: {}]   ;;  %s1528_s4 = inlined_call_operand.vmem [shape: f32[1,128], index: 4, kind: input, shape index: {}]   ;;  %s1529_s5 = inlined_call_operand.vmem [shape: f32[1,128], index: 5, kind: input, shape index: {}]   ;;  %s1530_s6 = inlined_call_operand.vmem [shape: bf16[128,256], index: 6, kind: input, shape index: {}]   ;;  %s1531_s7 = inlined_call_operand.vmem [shape: f32[1,256], index: 7, kind: input, shape index: {}]   ;;  %s1532_s8 = inlined_call_operand.vmem [shape: bf16[256,128], index: 8, kind: input, shape index: {}]   ;;  %s1533_s9 = inlined_call_operand.vmem [shape: f32[1,128], index: 9, kind: input, shape index: {}]   ;;  %s1534_s10 = inlined_call_operand.vmem [shape: bf16[2,16,128], index: 10, kind: output, shape index: {}]  }
   0x1   :  { %s1325_s15 = smov 0   ;;  %s1327_s16 = smov 0  }
   0x2   :  { %s1329_s17 = smov 0  }
   0x3 LB: > { %s29_s18 = sadd.s32 1, %s1253_s15  ;;  %s32_s19 = sadd.s32 1, %s1257_s16  ;;  %s1261_s17 = sphi %s1329_s17, %s20_s17   ;;  %s1257_s16 = sphi %s1327_s16, %s1538_s16   ;;  %s1253_s15 = sphi %s1325_s15, %s1537_s15   ;;  %s1249_s14 = sphi %s1323_s14, %s1536_s14   ;;  %s1245_s13 = sphi %s1321_s13, %s1535_s13  }
   0x4   : > { %p30_p0 = scmp.ge.s32.totalorder %s29_s18, 2  ;;  %p1022_p1 = scmp.ge.s32.totalorder %s1261_s17, 1 }
   0x5   : > { %p346_p2 = scmp.lt.s32.totalorder %s1261_s17, 5 }
   0x6   : > { %s1540_s18 = smov (%p30_p0, %s29_s18), 0  ;;  %s1542_s19 = smov (!%p30_p0, %s32_s19), %s1257_s16 }
   0x7   : > { %p347_p3 = pnand %p1022_p1, %p346_p2  ;;  %p34_p4 = scmp.ge.s32.totalorder %s1542_s19, 2 }
   0x8   : > { %v1169_v0 = vld [vmem:[%s1526_s2] sm:$0xff] (!%p347_p3)   ;;  %v1263_v1 = vmov (!%p347_p3), 0.0   ;;  %v1170_v2 = vld [vmem:[%s1526_s2 + $0x8] sm:$0xff] (!%p347_p3)   ;;  %vm1264_vm0 = vmmov (!%p347_p3), 0   ;;  %p398_p5 = scmp.lt.s32.totalorder (!%p347_p3), %s1249_s14, 1  ;;  %p400_p6 = scmp.lt.s32.totalorder (!%p347_p3), %s1245_s13, 1 }
   0x9   : > { %s1544_s19 = smov (%p34_p4, %s1542_s19), 0  ;;  %350 = sbr.rel (%p347_p3) target bundleno = 1034 (0x40a), region = 60 }
   0xa   : > { %1106 = vmatprep.subr.bf16.mxu0 (!%p347_p3), %v1263_v1  ;;  %1122 = vmatprep.mubr.msk.bf16.mxu0 (!%p347_p3), %vm1264_vm0, %v1263_v1  ;;  %v1171_v3 = vld [vmem:[%s1526_s2 + $0x10] sm:$0xff] (!%p347_p3)   ;;  %v1172_v4 = vld [vmem:[%s1526_s2 + $0x18] sm:$0xff] (!%p347_p3)   ;;  %v1173_v5 = vld [vmem:[%s1526_s2 + $0x20] sm:$0xff] (!%p347_p3)   ;;  %v1265_v34 = vmov (!%p347_p3), 0  }
   0xb   : > { %1107 = vmatpush3.bf16.msra.mxu0 (!%p347_p3), %v1169_v0  ;;  %v1174_v6 = vld [vmem:[%s1526_s2 + $0x28] sm:$0xff] (!%p347_p3)   ;;  %v1175_v7 = vld [vmem:[%s1526_s2 + $0x30] sm:$0xff] (!%p347_p3)   ;;  %v1176_v8 = vld [vmem:[%s1526_s2 + $0x38] sm:$0xff] (!%p347_p3)   ;;  %707 = vmatprep.mubr.bf16.mxu1 (!%p347_p3), %v1265_v34 }
   0xc   : > { %1108 = vmatprep.subr.bf16.mxu0 (!%p347_p3), %v1263_v1  ;;  %v1029_v11 = vld [vmem:[%s1527_s3] ss:$0 sm:$0xff] (!%p347_p3)  ;;  %v1177_v19 = vld [vmem:[%s1530_s6 + $0x4] ss:$8 sps:$4 sm:$0xff] (!%p347_p3)   ;;  %v1180_v21 = vld [vmem:[%s1530_s6 + $0x14] ss:$8 sps:$4 sm:$0xff] (!%p347_p3)  }
   0xd   : > { %v1179_v20 = vld [vmem:[%s1530_s6] ss:$8 sps:$4 sm:$0xff] (!%p347_p3)   ;;  %675 = vmatprep.subr.bf16.mxu1 (!%p347_p3), %v1177_v19  ;;  %v1182_v22 = vld [vmem:[%s1530_s6 + $0x10] ss:$8 sps:$4 sm:$0xff] (!%p347_p3)   ;;  %v1183_v23 = vld [vmem:[%s1530_s6 + $0x24] ss:$8 sps:$4 sm:$0xff] (!%p347_p3)  }
   0xe   : > { %676 = vmatpush1.bf16.msra.mxu1 (!%p347_p3), %v1179_v20  ;;  %v1185_v28 = vld [vmem:[%s1530_s6 + $0x20] ss:$8 sps:$4 sm:$0xff] (!%p347_p3)   ;;  %v1186_v29 = vld [vmem:[%s1530_s6 + $0x34] ss:$8 sps:$4 sm:$0xff] (!%p347_p3)   ;;  %v1188_v30 = vld [vmem:[%s1530_s6 + $0x30] ss:$8 sps:$4 sm:$0xff] (!%p347_p3)  }
   0xf   : > { %1109 = vmatpush3.bf16.msra.mxu0 (!%p347_p3), %v1170_v2  ;;  %677 = vmatprep.subr.bf16.mxu1 (!%p347_p3), %v1180_v21  ;;  %v1189_v31 = vld [vmem:[%s1530_s6 + $0x44] ss:$8 sps:$4 sm:$0xff] (!%p347_p3)   ;;  %v1191_v32 = vld [vmem:[%s1530_s6 + $0x40] ss:$8 sps:$4 sm:$0xff] (!%p347_p3)   ;;  %v1192_v33 = vld [vmem:[%s1530_s6 + $0x54] ss:$8 sps:$4 sm:$0xff] (!%p347_p3)   ;;  %v585_v2 = vlaneseq (!%p347_p3) }
  0x10   : > { %s1546_s14 = smov (!%p398_p5, %s1249_s14), 1  ;;  %1110 = vmatprep.subr.bf16.mxu0 %v1263_v1  ;;  %s1548_s13 = smov (!%p400_p6, %s1245_s13), 1  ;;  %v1194_v35 = vld [vmem:[%s1530_s6 + $0x50] ss:$8 sps:$4 sm:$0xff]   ;;  %v1195_v36 = vld [vmem:[%s1530_s6 + $0x64] ss:$8 sps:$4 sm:$0xff]  }
  0x11   : > { %s1023_s26 = sshll.u32 %s1546_s14, 1  ;;  %v1197_v37 = vld [vmem:[%s1530_s6 + $0x60] ss:$8 sps:$4 sm:$0xff]   ;;  %v1198_v38 = vld [vmem:[%s1530_s6 + $0x74] ss:$8 sps:$4 sm:$0xff]  }
  0x12   : > { %s403_s29 = sadd.s32 %s1023_s26, %s1548_s13  ;;  %678 = vmatpush1.bf16.msra.mxu1 %v1182_v22  ;;  %v1200_v39 = vld [vmem:[%s1530_s6 + $0x70] ss:$8 sps:$4 sm:$0xff]   ;;  %v1201_v40 = vld [vmem:[%s1532_s8 + $0x40] sm:$0xff]   ;;  %v1203_v52 = vld [vmem:[%s1532_s8 + $0x48] sm:$0xff]  }
  0x13   : > { %1111 = vmatpush3.bf16.msra.mxu0 %v1171_v3  ;;  %s1370_s12 = sshll.u32 %s403_s29, 2  ;;  %679 = vmatprep.subr.bf16.mxu1 %v1183_v23  ;;  %v1202_v41 = vld [vmem:[%s1532_s8] sm:$0xff]   ;;  %v1204_v53 = vld [vmem:[%s1532_s8 + $0x8] sm:$0xff]   ;;  %v1205_v54 = vld [vmem:[%s1532_s8 + $0x50] sm:$0xff]   ;;  %v586_v3 = vshrl.u32 %v585_v2, 7 }
  0x14   : > { %1112 = vmatprep.subr.bf16.mxu0 %v1263_v1  ;;  %s413_s26 = scalar_lea.vmem %s1525_s1, %s1370_s12  ;;  %s405_s29 = scalar_lea.vmem %s1524_s0, %s1370_s12  ;;  %v1038_v46 = vld [vmem:[%s1528_s4] ss:$0 sm:$0xff]  ;;  %v1206_v55 = vld [vmem:[%s1532_s8 + $0x10] sm:$0xff]   ;;  %v1207_v56 = vld [vmem:[%s1532_s8 + $0x58] sm:$0xff]  }
  0x15   : > { %v425_v9 = vld [vmem:[%s413_s26] sm:$0xf]  ;;  %v1208_v57 = vld [vmem:[%s1532_s8 + $0x18] sm:$0xff]   ;;  %v1211_v60 = vld [vmem:[%s1532_s8 + $0x68] sm:$0xff]   ;;  %s421_s13 = scalar_lea.vmem %s1534_s10, %s1370_s12 }
  0x16   : > { %v423_v10 = vld [vmem:[%s405_s29] sm:$0xf]  ;;  %680 = vmatpush1.bf16.msra.mxu1 %v1185_v28  ;;  %v1212_v61 = vld [vmem:[%s1532_s8 + $0x28] sm:$0xff]   ;;  %v1213_v62 = vld [vmem:[%s1532_s8 + $0x70] sm:$0xff]  }
  0x17   : > { %1113 = vmatpush3.bf16.msra.mxu0 %v1172_v4  ;;  %v424_v12 = vunpack.c.l.bf16 %v423_v10  ;;  %681 = vmatprep.subr.bf16.mxu1 %v1186_v29  ;;  %v1039_v48 = vld [vmem:[%s1529_s5] ss:$0 sm:$0xff]  ;;  %v1214_v63 = vld [vmem:[%s1532_s8 + $0x30] sm:$0xff]   ;;  %v1215_v0 = vld [vmem:[%s1532_s8 + $0x78] sm:$0xff]   ;;  %v587_v4 = vsub.s32 0, %v586_v3 }
  0x18   : > { %1114 = vmatprep.subr.bf16.mxu0 %v1263_v1  ;;  %v1209_v58 = vld [vmem:[%s1532_s8 + $0x60] sm:$0xff]  }
  0x19   : > { %v1210_v59 = vld [vmem:[%s1532_s8 + $0x20] sm:$0xff]  }
  0x1a   : > { %682 = vmatpush1.bf16.msra.mxu1 %v1188_v30 }
  0x1b   : > { %1115 = vmatpush3.bf16.msra.mxu0 %v1173_v5  ;;  %683 = vmatprep.subr.bf16.mxu1 %v1189_v31  ;;  %v583_v5 = vld [vmem:[%s1531_s7] sm:$0x3] }
  0x1c   : > { %1116 = vmatprep.subr.bf16.mxu0 %v1263_v1 }
  0x1e   : > { %684 = vmatpush1.bf16.msra.mxu1 %v1191_v32 }
  0x1f   : > { %1117 = vmatpush3.bf16.msra.mxu0 %v1174_v6  ;;  %685 = vmatprep.subr.bf16.mxu1 %v1192_v33  ;;  %v591_v6 = vsub.s32 1, %v586_v3 }
  0x20   : > { %1118 = vmatprep.subr.bf16.mxu0 %v1263_v1 }
  0x22   : > { %686 = vmatpush1.bf16.msra.mxu1 %v1194_v35 }
  0x23   : > { %1119 = vmatpush3.bf16.msra.mxu0 %v1175_v7  ;;  %687 = vmatprep.subr.bf16.mxu1 %v1195_v36  ;;  %v588_v7 = vrot.slane %v583_v5, %v587_v4 }
  0x24   : > { %1120 = vmatprep.subr.bf16.mxu0 %v1263_v1  ;;  %v1216_v1 = vld [vmem:[%s1532_s8 + $0x38] sm:$0xff]  }
  0x26   : > { %688 = vmatpush1.bf16.msra.mxu1 %v1197_v37  ;;  %v1056_v37 = vld [vmem:[%s1533_s9] ss:$0 sm:$0xff] }
  0x27   : > { %1121 = vmatpush3.bf16.msra.mxu0 %v1176_v8  ;;  %689 = vmatprep.subr.bf16.mxu1 %v1198_v38  ;;  %v592_v8 = vrot.slane %v583_v5, %v591_v6 }
  0x28   : > { %1084 = vmatprep.subr.bf16.mxu0 %v1201_v40 }
  0x2a   : > { %1123 = vmatmul.mubr.bf16.vlgmr.msra.gmra.mrb[0].mxu0 %v425_v9  ;;  %690 = vmatpush1.bf16.msra.mxu1 %v1200_v39 }
  0x2b   : > { %1085 = vmatpush3.bf16.msra.mxu0 %v1202_v41 }
  0x2c   : > { %1086 = vmatprep.subr.bf16.mxu0 %v1203_v52 }
  0x2f   : > { %1087 = vmatpush3.bf16.msra.mxu0 %v1204_v53 }
  0x30   : > { %1088 = vmatprep.subr.bf16.mxu0 %v1205_v54 }
  0x33   : > { %1089 = vmatpush3.bf16.msra.mxu0 %v1206_v55 }
  0x34   : > { %1090 = vmatprep.subr.bf16.mxu0 %v1207_v56 }
  0x37   : > { %1091 = vmatpush3.bf16.msra.mxu0 %v1208_v57 }
  0x38   : > { %1092 = vmatprep.subr.bf16.mxu0 %v1209_v58 }
  0x3b   : > { %1093 = vmatpush3.bf16.msra.mxu0 %v1210_v59 }
  0x3c   : > { %1094 = vmatprep.subr.bf16.mxu0 %v1211_v60 }
  0x3f   : > { %1095 = vmatpush3.bf16.msra.mxu0 %v1212_v61 }
  0x40   : > { %1096 = vmatprep.subr.bf16.mxu0 %v1213_v62 }
  0x43   : > { %1097 = vmatpush3.bf16.msra.mxu0 %v1214_v63 }
  0x44   : > { %1098 = vmatprep.subr.bf16.mxu0 %v1215_v0 }
  0x47   : > { %1099 = vmatpush3.bf16.msra.mxu0 %v1216_v1 }
  0xfd   : > { %v531_v13 = vpop.f32.mrb[0].mxu0 }
  0xfe   : > { %v532_v14 = vadd.f32 %v1029_v11, %v531_v13  ;;  %v1124_v15 = vpop.f32.mrb[1].mxu0 }
  0xff   : > { %v534_v16 = vpop.f32.mrb[2].mxu0 }
 0x100   : > { %v1392_v17 = vadd.f32 %v532_v14, %v424_v12  ;;  %v1125_v18 = vpop.f32.mrb[3].mxu0 }
 0x102   : > { %540 = vadd.xlane.f32.xlu0 %v1392_v17 }
 0x18f   : > { %v541_v24 = vpop.xlane.xlu0 %540 }
 0x190   : > { %v543_v25 = vmul.f32 0.0078125, %v541_v24 }
 0x192   : > { %v544_v26 = vsub.f32 %v1392_v17, %v543_v25 }
 0x194   : > { %v545_v27 = vmul.f32 %v544_v26, %v544_v26 }
 0x196   : > { %546 = vadd.xlane.f32.xlu0 %v545_v27 }
 0x223   : > { %v547_v42 = vpop.xlane.xlu0 %546 }
 0x224   : > { %v548_v43 = vmul.f32 0.0078125, %v547_v42 }
 0x226   : > { %v549_v44 = vadd.f32 1e-06, %v548_v43 }
 0x228   : > { %1217 = vrsqrt.f32 %v549_v44 }
 0x232   : > { %v1218_v45 = vpop.eup %1217 }
 0x233   : > { %v551_v47 = vmul.f32 %v1218_v45, %v544_v26 }
 0x235   : > { %v558_v49 = vmul.f32 %v1038_v46, %v551_v47 }
 0x237   : > { %v565_v50 = vadd.f32 %v1039_v48, %v558_v49 }
 0x239   : > { %v566_v51 = vpack.c.bf16 %v565_v50, %v565_v50 }
 0x23b   : > { %708 = vmatmul.mubr.bf16.vlgmr.msra.gmra.mrb[0].mxu1 %v566_v51 }
 0x30e   : > { %v709_v9 = vpop.f32.mrb[0].mxu1 }
 0x30f   : > { %v710_v10 = vadd.f32 %v709_v9, %v588_v7  ;;  %v711_v11 = vpop.f32.mrb[1].mxu1 }
 0x310   : > { %v712_v12 = vadd.f32 %v711_v11, %v592_v8  ;;  %v713_v13 = vpop.f32.mrb[2].mxu1 }
 0x311   : > { %v720_v14 = vmul.f32 0.044715, %v710_v10  ;;  %v714_v15 = vpop.f32.mrb[3].mxu1  ;;  %v718_v20 = vmul.f32 0.7978846, %v710_v10  ;;  %v716_v28 = vmul.f32 0.5, %v710_v10 }
 0x312   : > { %v721_v16 = vmul.f32 0.044715, %v712_v12  ;;  %v719_v22 = vmul.f32 0.7978846, %v712_v12  ;;  %v717_v30 = vmul.f32 0.5, %v712_v12 }
 0x313   : > { %v722_v18 = vmul.f32 %v720_v14, %v710_v10 }
 0x314   : > { %v723_v19 = vmul.f32 %v721_v16, %v712_v12 }
 0x315   : > { %v724_v21 = vadd.f32 1.0, %v722_v18 }
 0x316   : > { %v725_v23 = vadd.f32 1.0, %v723_v19 }
 0x317   : > { %v726_v24 = vmul.f32 %v724_v21, %v718_v20 }
 0x318   : > { %v727_v25 = vmul.f32 %v725_v23, %v719_v22 }
 0x319   : > { %1219 = vtanh.f32 %v726_v24 }
 0x31a   : > { %1221 = vtanh.f32 %v727_v25 }
 0x323   : > { %v1220_v26 = vpop.eup %1219 }
 0x324   : > { %v1222_v27 = vpop.eup %1221  ;;  %v730_v29 = vadd.f32 1.0, %v1220_v26 }
 0x325   : > { %v731_v31 = vadd.f32 1.0, %v1222_v27 }
 0x326   : > { %v732_v32 = vmul.f32 %v730_v29, %v716_v28 }
 0x327   : > { %v733_v33 = vmul.f32 %v731_v31, %v717_v30 }
 0x328   : > { %v734_v35 = vpack.c.bf16 %v732_v32, %v732_v32 }
 0x329   : > { %v735_v34 = vpack.c.bf16 %v733_v33, %v733_v33 }
 0x32b   : > { %903 = vmatprep.mubr.bf16.mxu0 %v735_v34 }
 0x32c   : > { %904 = vmatmul.mubr.bf16.vlgmr.msra.gmra.mrb[4].mxu0 %v734_v35 }
 0x3ff   : > { %v1100_v36 = vpop.f32.mrb[4].mxu0 }
 0x400   : > { %v1101_v38 = vpop.f32.mrb[5].mxu0 }
 0x401   : > { %v1102_v39 = vadd.f32 %v1101_v38, %v1100_v36  ;;  %v1103_v40 = vpop.f32.mrb[6].mxu0 }
 0x402   : > { %v1104_v41 = vpop.f32.mrb[7].mxu0 }
 0x403   : > { %v906_v42 = vadd.f32 %v1102_v39, %v1056_v37 }
 0x405   : > { %v911_v43 = vadd.f32 %v906_v42, %v1392_v17 }
 0x407   : > { %v912_v44 = vpack.c.bf16 %v911_v43, %v911_v43 }
 0x409   : > { %913 = vst [vmem:[%s421_s13] sm:$0xf] %v912_v44 }
 0x40a PF: > { %s20_s17 = sadd.s32 1, %s1261_s17   ;;  %s1535_s13 = smov %s1253_s15 }
 0x40b   : > { %p17_p7 = scmp.ge.s32.totalorder %s20_s17, 6   ;;  %s1536_s14 = smov %s1257_s16 }
 0x40c   : > { %s1537_s15 = smov %s1540_s18  ;;  %s1538_s16 = smov %s1544_s19 }
 0x40d   :  { %19 = sbr.rel (!%p17_p7) target bundleno = 3 (0x3), region = 93 }

// kernel: model_forward.15
= control target key start
LH: loop header
LB: loop body
LE: loop exit
PB: predicated region body
PF: predicated region fallthrough
CT: control target
= control target key end

     0   :  { %vm26_vm0 = vcmask 1041408   ;;  %s343_s0 = inlined_call_operand.vmem [shape: bf16[2,128], index: 0, kind: input, shape index: {}]   ;;  %s344_s1 = inlined_call_operand.vmem [shape: f32[1,128], index: 1, kind: input, shape index: {}]   ;;  %s345_s2 = inlined_call_operand.vmem [shape: f32[1,128], index: 2, kind: input, shape index: {}]   ;;  %s346_s3 = inlined_call_operand.vmem [shape: bf16[128,2], index: 3, kind: input, shape index: {}]   ;;  %s347_s4 = inlined_call_operand.vmem [shape: f32[1,2], index: 4, kind: input, shape index: {}]   ;;  %s348_s5 = inlined_call_operand.hbm [shape: f32[2,2], index: 5, kind: output, shape index: {}]  }
   0x1   :  { %v22_v0 = vld [vmem:[%s343_s0] sm:$0x1] }
   0x2   :  { %v23_v1 = vunpack.c.l.bf16 %v22_v0 }
   0x4   :  { %v27_v2 = vsel %vm26_vm0, %v23_v1, 0.0 }
   0x5   :  { %28 = vadd.xlane.f32.xlu0 %v27_v2 }
   0x6   :  { %10 = vsyncpa [#allocation3], 0  ;;  %v226_v3 = vld [vmem:[%s346_s3] sm:$0xff]   ;;  %v260_v4 = vmov 0.0   ;;  %v227_v5 = vld [vmem:[%s346_s3 + $0x8] sm:$0xff]   ;;  %vm261_vm1 = vmmov 0  }
   0x7   :  { %203 = vmatprep.subr.bf16.mxu0 %v260_v4  ;;  %v228_v11 = vld [vmem:[%s346_s3 + $0x10] sm:$0xff]   ;;  %v229_v12 = vld [vmem:[%s346_s3 + $0x18] sm:$0xff]   ;;  %v230_v13 = vld [vmem:[%s346_s3 + $0x20] sm:$0xff]   ;;  %219 = vmatprep.mubr.msk.bf16.mxu0 %vm261_vm1, %v260_v4  ;;  %s262_s15 = smov [#allocation2]   ;;  %vm167_vm2 = vcmask 9216  }
   0x8   :  { %204 = vmatpush3.bf16.msra.mxu0 %v226_v3  ;;  %v231_v14 = vld [vmem:[%s346_s3 + $0x28] sm:$0xff]   ;;  %v232_v15 = vld [vmem:[%s346_s3 + $0x30] sm:$0xff]   ;;  %v233_v16 = vld [vmem:[%s346_s3 + $0x38] sm:$0xff]   ;;  %s175_s16 = sshll.u32 %s262_s15, 4  ;;  %s176_s16 = int_to_ptr.vmem [resolvable:$true] %s175_s16 }
   0x9   :  { %205 = vmatprep.subr.bf16.mxu0 %v260_v4  ;;  %v183_v21 = vld [vmem:[%s344_s1] ss:$0 sm:$0xff]  ;;  %s236_s1 = scalar_lea.vmem %s176_s16, 32  ;;  %p241_p1 = scmp.lt.s32.totalorder %s176_s16, %s176_s16 }
   0xa   :  { %v184_v23 = vld [vmem:[%s345_s2] ss:$0 sm:$0xff]  ;;  %p237_p0 = scmp.ne.s32.totalorder %s176_s16, %s236_s1  ;;  %p242_p2 = scmp.lt.s32.totalorder %s236_s1, %s236_s1 }
   0xb   :  { %v185_v27 = vld [vmem:[%s347_s4] ss:$0 sm:$0xff] }
   0xc   :  { %206 = vmatpush3.bf16.msra.mxu0 %v227_v5  ;;  %p243_p3 = por %p242_p2, %p241_p1 }
   0xd   :  { %207 = vmatprep.subr.bf16.mxu0 %v260_v4 }
   0xe   :  { %p244_p4 = pnand %p243_p3, %p237_p0 }
  0x10   :  { %208 = vmatpush3.bf16.msra.mxu0 %v228_v11 }
  0x11   :  { %209 = vmatprep.subr.bf16.mxu0 %v260_v4 }
  0x14   :  { %210 = vmatpush3.bf16.msra.mxu0 %v229_v12 }
  0x15   :  { %211 = vmatprep.subr.bf16.mxu0 %v260_v4 }
  0x18   :  { %212 = vmatpush3.bf16.msra.mxu0 %v230_v13 }
  0x19   :  { %213 = vmatprep.subr.bf16.mxu0 %v260_v4 }
  0x1c   :  { %214 = vmatpush3.bf16.msra.mxu0 %v231_v14 }
  0x1d   :  { %215 = vmatprep.subr.bf16.mxu0 %v260_v4 }
  0x20   :  { %216 = vmatpush3.bf16.msra.mxu0 %v232_v15 }
  0x21   :  { %217 = vmatprep.subr.bf16.mxu0 %v260_v4 }
  0x24   :  { %218 = vmatpush3.bf16.msra.mxu0 %v233_v16 }
  0x92   :  { %v29_v6 = vpop.xlane.xlu0 %28 }
  0x93   :  { %v31_v7 = vmul.f32 0.0078125, %v29_v6 }
  0x95   :  { %v32_v8 = vsub.f32 %v23_v1, %v31_v7 }
  0x97   :  { %v33_v9 = vmul.f32 %v32_v8, %v32_v8 }
  0x99   :  { %v34_v10 = vsel %vm26_vm0, %v33_v9, 0.0 }
  0x9a   :  { %35 = vadd.xlane.f32.xlu0 %v34_v10 }
 0x127   :  { %v36_v17 = vpop.xlane.xlu0 %35 }
 0x128   :  { %v37_v18 = vmul.f32 0.0078125, %v36_v17 }
 0x12a   :  { %v38_v19 = vadd.f32 1e-06, %v37_v18 }
 0x12c   :  { %234 = vrsqrt.f32 %v38_v19 }
 0x136   :  { %v235_v20 = vpop.eup %234 }
 0x137   :  { %v40_v22 = vmul.f32 %v235_v20, %v32_v8 }
 0x139   :  { %v47_v24 = vmul.f32 %v183_v21, %v40_v22 }
 0x13b   :  { %v54_v25 = vadd.f32 %v184_v23, %v47_v24 }
 0x13d   :  { %v55_v26 = vpack.c.bf16 %v54_v25, %v54_v25 }
 0x13f   :  { %220 = vmatmul.mubr.bf16.vlgmr.msra.gmra.mrb[0].mxu0 %v55_v26 }
 0x212   :  { %v161_v28 = vpop.f32.mrb[0].mxu0 }
 0x213   :  { %v162_v29 = vadd.f32 %v185_v27, %v161_v28  ;;  %v221_v30 = vpop.f32.mrb[1].mxu0 }
 0x214   :  { %v164_v31 = vpop.f32.mrb[2].mxu0 }
 0x215   :  { %v222_v32 = vpop.f32.mrb[3].mxu0  ;;  %168 = vst.msk [vmem:[#allocation2] sm:$0x3] %vm167_vm2, %v162_v29 }
 0x216   :  { %247 = shalt.err (!%p244_p4)
}
 0x217   :  { %s248_s4 = scalar_lea.hbm %s348_s5, 32 }
 0x218   :  { %p249_p5 = scmp.ne.s32.totalorder %s348_s5, %s248_s4  ;;  %p252_p6 = scmp.lt.u32.totalorder %s248_s4, %s348_s5 }
 0x21a   :  { %p254_p7 = pnand %p252_p6, %p249_p5 }
 0x21c   :  { %257 = shalt.err (!%p254_p7)
}
 0x21d   :  { %178 = dma.vmem_to_hbm [thread:$0]  %s176_s16, 32, %s348_s5, [#allocation3]  }
 0x21e   :  { %258 = dma.done.wait [#allocation3], 32  }
 0x21f   :  { %259 = vsyncadd [#allocation3], 4294967264 }
 0x220   :  { %182 = vsyncpa [#allocation3], 1 }

</bundles_post_ra>
